<compile_context>
chip_gen: v7x
topology: tpu7x:2x2x1
jax: 0.10.0
libtpu: 0.0.40
codegen_flags: <defaults>
</compile_context>

<pallas_src>
import jax
import jax.numpy as jnp
from jax.experimental import pallas as pl
from jax.experimental.pallas import tpu as pltpu


# ---------------- slab layout (rows of a (SLAB_ROWS, 128) f32 array) ----------
LANES = 128
ROWS_W1 = 0      # rows 0..3    : l1.weight.T          (4, 25)  -> cols 0:25
ROWS_B1 = 8      # row  8       : l1.bias               (25,)    -> cols 0:25
ROWS_W2 = 16     # rows 16..143 : l2.weight.T          (25, 50) -> rows 16..40, cols 0:50
ROWS_B2 = 144    # row  144     : l2.bias               (50,)    -> cols 0:50
ROWS_WH = 152    # rows 152..279: [actor_lin1.T | l3.T] (50, 27) -> rows 152..201, cols 0:2 / 2:27
ROWS_BH = 280    # row  280     : [actor_lin1.b | l3.b] (27,)    -> cols 0:2 / 2:27
ROWS_WC = 288    # row  288     : critic_lin1.weight    (25,)    -> cols 2:27  (cols 0:2 MUST stay 0)
ROWS_BC = 289    # row  289     : critic_lin1.bias               -> col 2 only
SLAB_ROWS = 296  # ~148 KiB resident weight slab (was 424 rows)

TILE_B_MAX = 1024


def _round_up(n, m):
    return ((n + m - 1) // m) * m


# ------------------------------- kernel --------------------------------------
def _actor_critic_kernel(x_ref, slab_ref, out_ref):
    x = x_ref[...]                                            # (T, 4) f32

    # F.normalize(x, dim=0) applied per state: x * rsqrt(max(sum(x^2), eps^2))
    s = jnp.sum(x * x, axis=-1, keepdims=True)
    xn = x * jax.lax.rsqrt(jnp.maximum(s, 1e-24))

    # layer 1 (4 -> 25) as 4 VPU broadcast FMAs: K=4 is far below MXU granularity.
    w1 = slab_ref[pl.ds(ROWS_W1, 4), :]                       # (4, 128)
    b1 = slab_ref[pl.ds(ROWS_B1, 1), :]                       # (1, 128)
    y = b1 + xn[:, 0:1] * w1[0:1, :]
    y = y + xn[:, 1:2] * w1[1:2, :]
    y = y + xn[:, 2:3] * w1[2:3, :]
    y = y + xn[:, 3:4] * w1[3:4, :]
    y = jnp.maximum(y, 0.0)                                   # lanes 25..127 exactly 0

    # y = relu(l2(y))   (cols 0..49 valid, rest exactly zero)
    w2 = slab_ref[pl.ds(ROWS_W2, 128), :]                     # (128, 128)
    b2 = slab_ref[pl.ds(ROWS_B2, 1), :]
    y = jnp.maximum(
        jnp.dot(y, w2, preferred_element_type=jnp.float32) + b2, 0.0)

    # fused head: z[:, 0:2] = actor logits, z[:, 2:27] = l3 pre-activation
    wh = slab_ref[pl.ds(ROWS_WH, 128), :]                     # (128, 128)
    bh = slab_ref[pl.ds(ROWS_BH, 1), :]
    z = jnp.dot(y, wh, preferred_element_type=jnp.float32) + bh

    # log_softmax over the 2 actor lanes (masked full-width math, no lane slicing)
    lane = jax.lax.broadcasted_iota(jnp.int32, z.shape, 1)
    is_actor = lane < 2
    neg = jnp.float32(-1e30)
    m = jnp.max(jnp.where(is_actor, z, neg), axis=-1, keepdims=True)
    p = jnp.exp(jnp.where(is_actor, z - m, neg))
    lse = jnp.log(jnp.sum(p, axis=-1, keepdims=True)) + m
    actor_full = z - lse                                      # valid at lanes 0,1

    # critic branch: c = relu(l3(y.detach())); critic = tanh(critic_lin1(c))
    # (detach is grad-only; forward values identical).  critic_lin1 is a VPU
    # multiply + XLU reduce against one weight row (lanes 0:2 of wc are 0, so
    # the relu'd actor-logit lanes of c never contribute).
    c = jnp.maximum(z, 0.0)                                   # lanes 2..26 = relu(l3)
    wc = slab_ref[pl.ds(ROWS_WC, 1), :]                       # (1, 128), cols 2:27 valid
    bc = slab_ref[pl.ds(ROWS_BC, 1), :]                       # (1, 128), col 2 = bias
    bcs = jnp.sum(bc, axis=-1, keepdims=True)                 # (1, 1) scalar bias
    cp = jnp.sum(c * wc, axis=-1, keepdims=True)              # (T, 1)
    critic_col = jnp.tanh(cp + bcs)                           # (T, 1)

    # single lane-dense store: lanes 0,1 actor log-probs, lane 2 critic, rest 0
    out = jnp.where(is_actor, actor_full, 0.0)
    out = jnp.where(lane == 2, critic_col, out)
    out_ref[...] = out


# ----------------------------- host wrappers ----------------------------------
def pack_params(params):
    """One-time packing of PyTorch-layout params into the (296,128) f32 slab.

    Correctness of the fused head relies on the zero-padding (wh cols 27..127,
    bh lanes >=27, wc lanes 0..1 and 27..127, bc lanes != 2) staying exactly 0.
    """
    (w1, b1), (w2, b2), (wa, ba), (w3, b3), (wc, bc) = params
    slab = jnp.zeros((SLAB_ROWS, LANES), jnp.float32)
    slab = slab.at[ROWS_W1:ROWS_W1 + 4, 0:25].set(w1.T.astype(jnp.float32))
    slab = slab.at[ROWS_B1, 0:25].set(b1.astype(jnp.float32))
    slab = slab.at[ROWS_W2:ROWS_W2 + 25, 0:50].set(w2.T.astype(jnp.float32))
    slab = slab.at[ROWS_B2, 0:50].set(b2.astype(jnp.float32))
    slab = slab.at[ROWS_WH:ROWS_WH + 50, 0:2].set(wa.T.astype(jnp.float32))
    slab = slab.at[ROWS_WH:ROWS_WH + 50, 2:27].set(w3.T.astype(jnp.float32))
    slab = slab.at[ROWS_BH, 0:2].set(ba.astype(jnp.float32))
    slab = slab.at[ROWS_BH, 2:27].set(b3.astype(jnp.float32))
    slab = slab.at[ROWS_WC, 2:27].set(wc[0, :].astype(jnp.float32))
    slab = slab.at[ROWS_BC, 2].set(bc[0].astype(jnp.float32))
    return slab


def actor_critic_forward(x, slab):
    """x: (4,) single state or (B, 4) batch of states.  Returns (actor, critic)."""
    x = jnp.asarray(x, jnp.float32)
    single = (x.ndim == 1)
    if single:
        x = x[None, :]
    B = x.shape[0]

    # Large tiles amortize per-grid-step overhead; cap at half the batch so big
    # batches keep >=2 grid steps ("parallel" axis -> both TCs on v7x).
    half = _round_up(max(1, -(-B // 2)), 8)
    tile_b = max(8, min(TILE_B_MAX, half))
    Bp = _round_up(B, tile_b)
    if Bp != B:
        x = jnp.pad(x, ((0, Bp - B), (0, 0)))
    grid = (Bp // tile_b,)

    out = pl.pallas_call(
        _actor_critic_kernel,
        out_shape=jax.ShapeDtypeStruct((Bp, LANES), jnp.float32),
        grid_spec=pltpu.PrefetchScalarGridSpec(
            num_scalar_prefetch=0,
            grid=grid,
            in_specs=[
                pl.BlockSpec((tile_b, 4), lambda i: (i, 0)),
                pl.BlockSpec((SLAB_ROWS, LANES), lambda i: (0, 0)),  # resident weights
            ],
            out_specs=pl.BlockSpec((tile_b, LANES), lambda i: (i, 0)),
        ),
        compiler_params=pltpu.CompilerParams(
            dimension_semantics=("parallel",)),
        cost_estimate=pl.CostEstimate(
            flops=5500 * Bp,
            transcendentals=132 * Bp,
            bytes_accessed=Bp * 16 + SLAB_ROWS * LANES * 4 + Bp * LANES * 4),
    )(x, slab)

    actor = out[:B, 0:2]
    critic = out[:B, 2:3]
    if single:
        actor = actor[0]
        critic = critic[0]
    return actor, critic


# ----------------------------- init & reference -------------------------------
def init_params(key):
    """PyTorch nn.Linear default init: U(-1/sqrt(fan_in), 1/sqrt(fan_in)); (out,in) layout."""
    dims = [(4, 25), (25, 50), (50, 2), (50, 25), (25, 1)]
    params = []
    for (fan_in, fan_out) in dims:
        key, kw, kb = jax.random.split(key, 3)
        bound = 1.0 / jnp.sqrt(jnp.float32(fan_in))
        w = jax.random.uniform(kw, (fan_out, fan_in), jnp.float32, -bound, bound)
        b = jax.random.uniform(kb, (fan_out,), jnp.float32, -bound, bound)
        params.append((w, b))
    return params


def _reference_forward(x, params):
    """Pure-JAX reference: the PyTorch forward applied state-wise (vmap over B)."""
    (w1, b1), (w2, b2), (wa, ba), (w3, b3), (wc, bc) = params

    def single(xi):
        xn = xi / jnp.maximum(jnp.linalg.norm(xi), 1e-12)
        y = jax.nn.relu(xn @ w1.T + b1)
        y = jax.nn.relu(y @ w2.T + b2)
        actor = jax.nn.log_softmax(y @ wa.T + ba, axis=0)
        c = jax.nn.relu(y @ w3.T + b3)
        critic = jnp.tanh(c @ wc.T + bc)
        return actor, critic

    return jax.vmap(single)(x)


if __name__ == "__main__":
    key = jax.random.PRNGKey(0)
    key, kx = jax.random.split(key)

    B = 256                                   # rollout batch of CartPole states
    x = jax.random.normal(kx, (B, 4), jnp.float32)
    params = init_params(key)
    slab = pack_params(params)                # one-time packing (hoisted out of hot path)

    actor, critic = actor_critic_forward(x, slab)
    jax.block_until_ready((actor, critic))
    assert actor.shape == (B, 2) and critic.shape == (B, 1)

    ref_actor, ref_critic = _reference_forward(x, params)
    assert jnp.allclose(actor, ref_actor, atol=2e-5, rtol=2e-5)
    assert jnp.allclose(critic, ref_critic, atol=2e-5, rtol=2e-5)

    # single-state path (matches the original module's (4,) -> ((2,), (1,)) API)
    a1, c1 = actor_critic_forward(x[0], slab)
    jax.block_until_ready((a1, c1))
    assert a1.shape == (2,) and c1.shape == (1,)
    assert jnp.allclose(a1, ref_actor[0], atol=2e-5, rtol=2e-5)
    assert jnp.allclose(c1, ref_critic[0], atol=2e-5, rtol=2e-5)

    print("KERNEL_OK")
</pallas_src>

<mosaic_0001>
module attributes {stable_mosaic.version = 11 : i64} {
  func.func @_actor_critic_kernel(%arg0: i32, %arg1: memref<128x4xf32, #tpu.memory_space<vmem>>, %arg2: memref<296x128xf32, #tpu.memory_space<vmem>>, %arg3: memref<128x128xf32, #tpu.memory_space<vmem>>) attributes {dimension_semantics = [#tpu.dimension_semantics<parallel>], iteration_bounds = array<i64: 2>, scalar_prefetch = 0 : i64, scratch_operands = 0 : i64, tpu.core_type = #tpu.core_type<tc>, window_params = [{transform_indices = @transform_0, window_bounds = array<i64: 128, 4>}, {pipeline_mode = #tpu.pipeline_mode<synchronous>, transform_indices = @transform_1, window_bounds = array<i64: 296, 128>}, {transform_indices = @transform_2, window_bounds = array<i64: 128, 128>}]} {
    %c0 = arith.constant 0 : index
    %c0_0 = arith.constant 0 : index
    %0 = vector.load %arg1[%c0, %c0_0] : memref<128x4xf32, #tpu.memory_space<vmem>>, vector<128x4xf32>
    %1 = arith.mulf %0, %0 : vector<128x4xf32>
    %cst = arith.constant dense<0.000000e+00> : vector<128xf32>
    %2 = vector.multi_reduction <add>, %1, %cst [1] : vector<128x4xf32> to vector<128xf32>
    %3 = vector.shape_cast %2 : vector<128xf32> to vector<128x1xf32>
    %cst_1 = arith.constant 1.000000e-24 : f32
    %4 = vector.broadcast %cst_1 : f32 to vector<128x1xf32>
    %5 = arith.maximumf %3, %4 : vector<128x1xf32>
    %6 = math.rsqrt %5 : vector<128x1xf32>
    %7 = vector.broadcast %6 : vector<128x1xf32> to vector<128x4xf32>
    %8 = arith.mulf %0, %7 : vector<128x4xf32>
    %c0_2 = arith.constant 0 : index
    %c0_3 = arith.constant 0 : index
    %9 = vector.load %arg2[%c0_2, %c0_3] : memref<296x128xf32, #tpu.memory_space<vmem>>, vector<4x128xf32>
    %c8 = arith.constant 8 : index
    %c0_4 = arith.constant 0 : index
    %10 = vector.load %arg2[%c8, %c0_4] : memref<296x128xf32, #tpu.memory_space<vmem>>, vector<1x128xf32>
    %11 = vector.extract_strided_slice %8 {offsets = [0, 0], sizes = [128, 1], strides = [1, 1]} : vector<128x4xf32> to vector<128x1xf32>
    %12 = vector.extract_strided_slice %9 {offsets = [0, 0], sizes = [1, 128], strides = [1, 1]} : vector<4x128xf32> to vector<1x128xf32>
    %13 = vector.broadcast %11 : vector<128x1xf32> to vector<128x128xf32>
    %14 = vector.broadcast %12 : vector<1x128xf32> to vector<128x128xf32>
    %15 = arith.mulf %13, %14 : vector<128x128xf32>
    %16 = vector.broadcast %10 : vector<1x128xf32> to vector<128x128xf32>
    %17 = arith.addf %16, %15 : vector<128x128xf32>
    %18 = vector.extract_strided_slice %8 {offsets = [0, 1], sizes = [128, 1], strides = [1, 1]} : vector<128x4xf32> to vector<128x1xf32>
    %19 = vector.extract_strided_slice %9 {offsets = [1, 0], sizes = [1, 128], strides = [1, 1]} : vector<4x128xf32> to vector<1x128xf32>
    %20 = vector.broadcast %18 : vector<128x1xf32> to vector<128x128xf32>
    %21 = vector.broadcast %19 : vector<1x128xf32> to vector<128x128xf32>
    %22 = arith.mulf %20, %21 : vector<128x128xf32>
    %23 = arith.addf %17, %22 : vector<128x128xf32>
    %24 = vector.extract_strided_slice %8 {offsets = [0, 2], sizes = [128, 1], strides = [1, 1]} : vector<128x4xf32> to vector<128x1xf32>
    %25 = vector.extract_strided_slice %9 {offsets = [2, 0], sizes = [1, 128], strides = [1, 1]} : vector<4x128xf32> to vector<1x128xf32>
    %26 = vector.broadcast %24 : vector<128x1xf32> to vector<128x128xf32>
    %27 = vector.broadcast %25 : vector<1x128xf32> to vector<128x128xf32>
    %28 = arith.mulf %26, %27 : vector<128x128xf32>
    %29 = arith.addf %23, %28 : vector<128x128xf32>
    %30 = vector.extract_strided_slice %8 {offsets = [0, 3], sizes = [128, 1], strides = [1, 1]} : vector<128x4xf32> to vector<128x1xf32>
    %31 = vector.extract_strided_slice %9 {offsets = [3, 0], sizes = [1, 128], strides = [1, 1]} : vector<4x128xf32> to vector<1x128xf32>
    %32 = vector.broadcast %30 : vector<128x1xf32> to vector<128x128xf32>
    %33 = vector.broadcast %31 : vector<1x128xf32> to vector<128x128xf32>
    %34 = arith.mulf %32, %33 : vector<128x128xf32>
    %35 = arith.addf %29, %34 : vector<128x128xf32>
    %cst_5 = arith.constant 0.000000e+00 : f32
    %36 = vector.broadcast %cst_5 : f32 to vector<128x128xf32>
    %37 = arith.maximumf %35, %36 : vector<128x128xf32>
    %c16 = arith.constant 16 : index
    %c0_6 = arith.constant 0 : index
    %38 = vector.load %arg2[%c16, %c0_6] : memref<296x128xf32, #tpu.memory_space<vmem>>, vector<128x128xf32>
    %c144 = arith.constant 144 : index
    %c0_7 = arith.constant 0 : index
    %39 = vector.load %arg2[%c144, %c0_7] : memref<296x128xf32, #tpu.memory_space<vmem>>, vector<1x128xf32>
    %cst_8 = arith.constant dense<0.000000e+00> : vector<128x128xf32>
    %40 = tpu.matmul %37, %38, %cst_8 {dimension_numbers = #tpu.dot_dimension_numbers<[1], [0], [0], [1], [0, 0, 1, 1], [], []>} : vector<128x128xf32>, vector<128x128xf32>, vector<128x128xf32> -> vector<128x128xf32>
    %41 = vector.broadcast %39 : vector<1x128xf32> to vector<128x128xf32>
    %42 = arith.addf %40, %41 : vector<128x128xf32>
    %cst_9 = arith.constant 0.000000e+00 : f32
    %43 = vector.broadcast %cst_9 : f32 to vector<128x128xf32>
    %44 = arith.maximumf %42, %43 : vector<128x128xf32>
    %c152 = arith.constant 152 : index
    %c0_10 = arith.constant 0 : index
    %45 = vector.load %arg2[%c152, %c0_10] : memref<296x128xf32, #tpu.memory_space<vmem>>, vector<128x128xf32>
    %c280 = arith.constant 280 : index
    %c0_11 = arith.constant 0 : index
    %46 = vector.load %arg2[%c280, %c0_11] : memref<296x128xf32, #tpu.memory_space<vmem>>, vector<1x128xf32>
    %cst_12 = arith.constant dense<0.000000e+00> : vector<128x128xf32>
    %47 = tpu.matmul %44, %45, %cst_12 {dimension_numbers = #tpu.dot_dimension_numbers<[1], [0], [0], [1], [0, 0, 1, 1], [], []>} : vector<128x128xf32>, vector<128x128xf32>, vector<128x128xf32> -> vector<128x128xf32>
    %48 = vector.broadcast %46 : vector<1x128xf32> to vector<128x128xf32>
    %49 = arith.addf %47, %48 : vector<128x128xf32>
    %50 = tpu.iota {dimensions = array<i32: 1>} : vector<128x128xi32>
    %c2_i32 = arith.constant 2 : i32
    %51 = vector.broadcast %c2_i32 : i32 to vector<128x128xi32>
    %52 = arith.cmpi slt, %50, %51 : vector<128x128xi32>
    %cst_13 = arith.constant -1.000000e+30 : f32
    %53 = vector.broadcast %cst_13 : f32 to vector<128x128xf32>
    %54 = arith.select %52, %49, %53 : vector<128x128xi1>, vector<128x128xf32>
    %cst_14 = arith.constant dense<0xFF800000> : vector<128xf32>
    %55 = vector.multi_reduction <maximumf>, %54, %cst_14 [1] : vector<128x128xf32> to vector<128xf32>
    %56 = vector.shape_cast %55 : vector<128xf32> to vector<128x1xf32>
    %57 = vector.broadcast %56 : vector<128x1xf32> to vector<128x128xf32>
    %58 = arith.subf %49, %57 : vector<128x128xf32>
    %cst_15 = arith.constant -1.000000e+30 : f32
    %59 = vector.broadcast %cst_15 : f32 to vector<128x128xf32>
    %60 = arith.select %52, %58, %59 : vector<128x128xi1>, vector<128x128xf32>
    %61 = math.exp %60 : vector<128x128xf32>
    %cst_16 = arith.constant dense<0.000000e+00> : vector<128xf32>
    %62 = vector.multi_reduction <add>, %61, %cst_16 [1] : vector<128x128xf32> to vector<128xf32>
    %63 = vector.shape_cast %62 : vector<128xf32> to vector<128x1xf32>
    %64 = math.log %63 : vector<128x1xf32>
    %65 = arith.addf %64, %56 : vector<128x1xf32>
    %66 = vector.broadcast %65 : vector<128x1xf32> to vector<128x128xf32>
    %67 = arith.subf %49, %66 : vector<128x128xf32>
    %cst_17 = arith.constant 0.000000e+00 : f32
    %68 = vector.broadcast %cst_17 : f32 to vector<128x128xf32>
    %69 = arith.maximumf %49, %68 : vector<128x128xf32>
    %c288 = arith.constant 288 : index
    %c0_18 = arith.constant 0 : index
    %70 = vector.load %arg2[%c288, %c0_18] : memref<296x128xf32, #tpu.memory_space<vmem>>, vector<1x128xf32>
    %c289 = arith.constant 289 : index
    %c0_19 = arith.constant 0 : index
    %71 = vector.load %arg2[%c289, %c0_19] : memref<296x128xf32, #tpu.memory_space<vmem>>, vector<1x128xf32>
    %cst_20 = arith.constant dense<0.000000e+00> : vector<1xf32>
    %72 = vector.multi_reduction <add>, %71, %cst_20 [1] : vector<1x128xf32> to vector<1xf32>
    %73 = vector.shape_cast %72 : vector<1xf32> to vector<1x1xf32>
    %74 = vector.broadcast %70 : vector<1x128xf32> to vector<128x128xf32>
    %75 = arith.mulf %69, %74 : vector<128x128xf32>
    %cst_21 = arith.constant dense<0.000000e+00> : vector<128xf32>
    %76 = vector.multi_reduction <add>, %75, %cst_21 [1] : vector<128x128xf32> to vector<128xf32>
    %77 = vector.shape_cast %76 : vector<128xf32> to vector<128x1xf32>
    %78 = vector.broadcast %73 : vector<1x1xf32> to vector<128x1xf32>
    %79 = arith.addf %77, %78 : vector<128x1xf32>
    %80 = math.tanh %79 : vector<128x1xf32>
    %cst_22 = arith.constant 0.000000e+00 : f32
    %81 = vector.broadcast %cst_22 : f32 to vector<128x128xf32>
    %82 = arith.select %52, %67, %81 : vector<128x128xi1>, vector<128x128xf32>
    %c2_i32_23 = arith.constant 2 : i32
    %83 = vector.broadcast %c2_i32_23 : i32 to vector<128x128xi32>
    %84 = arith.cmpi eq, %50, %83 : vector<128x128xi32>
    %85 = vector.shape_cast %80 : vector<128x1xf32> to vector<128x1xf32>
    %86 = vector.broadcast %85 : vector<128x1xf32> to vector<128x128xf32>
    %87 = arith.select %84, %86, %82 : vector<128x128xi1>, vector<128x128xf32>
    %c0_24 = arith.constant 0 : index
    %c0_25 = arith.constant 0 : index
    %88 = vector.load %arg3[%c0_24, %c0_25] : memref<128x128xf32, #tpu.memory_space<vmem>>, vector<128x128xf32>
    tpu.vector_store %arg3[%c0_24, %c0_25], %87 {strides = array<i32>} : memref<128x128xf32, #tpu.memory_space<vmem>>, vector<128x128xf32>,
    return
  }
  func.func @transform_0(%arg0: i32) -> (i32, i32) {
    %c0_i32 = arith.constant 0 : i32
    %c0_i32_0 = arith.constant 0 : i32
    return %arg0, %c0_i32 : i32, i32
  }
  func.func @transform_1(%arg0: i32) -> (i32, i32) {
    %c0_i32 = arith.constant 0 : i32
    %c0_i32_0 = arith.constant 0 : i32
    %c0_i32_1 = arith.constant 0 : i32
    return %c0_i32, %c0_i32_0 : i32, i32
  }
  func.func @transform_2(%arg0: i32) -> (i32, i32) {
    %c0_i32 = arith.constant 0 : i32
    %c0_i32_0 = arith.constant 0 : i32
    return %arg0, %c0_i32 : i32, i32
  }
}

</mosaic_0001>

<bundles_post_ra>
// kernel: tpu_custom_call.1
= control target key start
LH: loop header
LB: loop body
LE: loop exit
PB: predicated region body
PF: predicated region fallthrough
CT: control target
= control target key end

     0   :  { %7 = vsyncpa [#allocation3], 0  ;;  %s3019_s0 = inlined_call_operand.vmem [shape: f32[256,4], index: 0, kind: input, shape index: {}]   ;;  %s3020_s1 = inlined_call_operand.hbm [shape: f32[296,128], index: 1, kind: input, shape index: {}]   ;;  %s3021_s2 = inlined_call_operand.hbm [shape: f32[256,128], index: 2, kind: output, shape index: {}]  }
   0x1   :  { %8 = vsyncpa [#allocation4], 0 }
   0x2   :  { %10 = vsyncpa [#allocation4 + $0x1], 0  ;;  %s2147_s9 = smov 0   ;;  %s2149_s10 = smov 0  }
   0x3   :  { %s2151_s11 = smov 0   ;;  %s2153_s12 = smov 0  }
   0x4 LB: > { %s2168_s13 = sadd.s32 4294967295, %s2120_s12   ;;  %s1533_s14 = sadd.s32 4294967294, %s2120_s12   ;;  %s2120_s12 = sphi %s2153_s12, %s3037_s12   ;;  %s2116_s11 = sphi %s2151_s11, %s3036_s11   ;;  %s2112_s10 = sphi %s2149_s10, %s3035_s10   ;;  %s2108_s9 = sphi %s2147_s9, %s3034_s9  }
   0x5   : > { %s2172_s15 = sadd.s32 1, %s2120_s12   ;;  %s70_s16 = sadd.s32 1, %s2116_s11 }
   0x6   : > { %s67_s17 = ssub.s32 %s2120_s12, %s2172_s15  ;;  %p80_p0 = scmp.ne.s32.totalorder %s2116_s11, %s2112_s10 }
   0x7   : > { %p68_p1 = scmp.eq.s32.totalorder %s67_s17, 0  ;;  %p81_p2 = scmp.eq.s32.totalorder %s2168_s13, 1 }
   0x8   : > { %p86_p3 = scmp.ne.s32.totalorder %s2112_s10, %s2108_s9  ;;  %p87_p4 = scmp.eq.s32.totalorder %s1533_s14, 1 }
   0x9   : > { %s2183_s18 = scalar_select %p68_p1, %s2116_s11, %s70_s16  }
   0xa   : > { %p2185_p5 = por %p81_p2, %p80_p0  ;;  %p2189_p6 = por %p87_p4, %p86_p3 }
   0xb   : > { %p1534_p7 = scmp.ge.s32.totalorder %s2120_s12, 1  ;;  %p94_p8 = scmp.lt.s32.totalorder %s2120_s12, 3 }
   0xc   : > { %s3025_s19 = scalar_select %p2185_p5, 1, 0 }
   0xd   : > { %s3026_s20 = scalar_select %p2189_p6, 1, 0 }
   0xe   : > { %p3022_p9 = scmp.eq.s32.totalorder %s2168_s13, 0  ;;  %p2196_p10 = pnand %p1534_p7, %p94_p8 }
   0xf   : > { %s2122_s22 = smov [#allocation2]   ;;  %s2026_s27 = scalar_lea.hbm %s3020_s1, 4736 }
  0x10   : > { %s3027_s21 = scalar_select %p2196_p10, 1, 0 }
  0x11   : > { %s106_s23 = sshll.u32 %s2122_s22, 4  ;;  %p1798_p11 = pneg %p2196_p10  ;;  %s107_s23 = int_to_ptr.vmem [resolvable:$true] %s106_s23 }
  0x12   : > { %p2027_p13 = scmp.ne.s32.totalorder %s3020_s1, %s2026_s27  ;;  %p2033_p3 = scmp.lt.u32.totalorder %s2026_s27, %s3020_s1 }
  0x13   : > { %p2204_p12 = pnand %p3022_p9, %p1798_p11 }
  0x15   : > { %p2028_p0 = pneg %p2204_p12 }
  0x17   : > { %p2029_p1 = pnand %p2028_p0, %p2027_p13 }
  0x19   : > { %p2030_p2 = pneg %p2029_p1 }
  0x1b   : > { %p2035_p4 = pnand %p2033_p3, %p2030_p2 }
  0x1d   : > { %2038 = shalt.err (!%p2035_p4)
}
  0x1e   : > { %s2039_s4 = scalar_lea.vmem %s107_s23, 4736  ;;  %p2047_p9 = scmp.lt.s32.totalorder %s107_s23, %s107_s23 }
  0x1f   : > { %p2040_p7 = scmp.ne.s32.totalorder %s107_s23, %s2039_s4  ;;  %p2048_p6 = scmp.lt.s32.totalorder %s2039_s4, %s2039_s4 }
  0x21   : > { %p2042_p8 = pnand %p2040_p7, %p2028_p0  ;;  %p2049_p5 = por %p2048_p6, %p2047_p9 }
  0x23   : > { %p2043_p11 = pneg %p2042_p8 }
  0x25   : > { %p2050_p10 = pnand %p2049_p5, %p2043_p11 }
  0x27   : > { %2053 = shalt.err (!%p2050_p10)
}
  0x28   : > { %s2123_s5 = smov 128   ;;  %s2124_s6 = smov 8  }
  0x29   : > { %1801 = dma.hbm_to_vmem [thread:$0]  (!%p2204_p12), %s3020_s1, 4736, %s107_s23, [#allocation3], %s2123_s5, %s2123_s5, %s2124_s6  }
  0x2a   : > { %p3029_p13 = scmp.ne.s32.totalorder %s3027_s21, 0 }
  0x2b   : > { %p3030_p1 = scmp.eq.s32.totalorder (!%p3029_p13), %s2168_s13, 0 }
  0x2c   : > { %131 = sbr.rel (%p3029_p13) target bundleno = 1334 (0x536), region = 28 }
  0x33   : > { %2099 = dma.done.wait (%p3030_p1), [#allocation3], 4736   ;;  %p3031_p0 = pmov %p3030_p1 }
  0x34   : > { %s1540_s14 = sshll.u32 %s2168_s13, 4  ;;  %vm192_vm0 = vcmask 31744   ;;  %v2125_v46 = vmov 0   ;;  %vm1304_vm2 = vcmask 1040384   ;;  %s150_s21 = sand.u32 1, %s2112_s10  }
  0x35   : > { %2101 = vsyncadd (%p3031_p0), [#allocation3], 4294962560  ;;  %p154_p5 = scmp.lt.s32.totalorder %s1540_s14, 31  ;;  %1850 = vset.pattern.permute.xlu0 %v2125_v46  ;;  %1851 = vset.pattern.permute.xlu1 %v2125_v46  ;;  %s1539_s23 = sshll.u32 %s150_s21, 7 }
  0x36   : > { %s2845_s25 = scalar_lea.vmem [#allocation5], %s1539_s23  ;;  %s1551_s26 = sshll.u32 %s2168_s13, 11 }
  0x37   : > { %s3039_s14 = smov (!%p154_p5, %s1540_s14), 31  ;;  %s1459_s27 = sshll.u32 %s2845_s25, 4  ;;  %s2966_s27 = int_to_ptr.vmem [resolvable:$true] %s1459_s27 }
  0x38   : > { %s1541_s16 = sshll.u32 %s3039_s14, 3  ;;  %s2964_s30 = scalar_lea.hbm %s3021_s2, %s1551_s26 }
  0x39   : > { %s2234_s24 = scalar_lea.vmem %s3019_s0, %s1541_s16  ;;  %s2978_s13 = scalar_lea.sflag [#allocation4], %s150_s21 }
  0x3a   : > { %v2237_v0 = vld [vmem:[%s2234_s24] sm:$0xff]  ;;  %v2240_v1 = vld [vmem:[%s2234_s24 + $0x8] sm:$0xff]  ;;  %v2243_v2 = vld [vmem:[%s2234_s24 + $0x10] sm:$0xff]  ;;  %s2054_s3 = scalar_lea.vmem %s2966_s27, 2048  ;;  %p3032_p9 = scmp.ne.s32.totalorder %s3025_s19, 0 }
  0x3b   : > { %v176_v3 = vmul.f32 %v2237_v0, %v2237_v0  ;;  %v177_v4 = vmul.f32 %v2240_v1, %v2240_v1  ;;  %v178_v5 = vmul.f32 %v2243_v2, %v2243_v2  ;;  %v2252_v6 = vld [vmem:[%s2234_s24 + $0x18] sm:$0xff]  ;;  %v2255_v7 = vld [vmem:[%s2234_s24 + $0x20] sm:$0xff]  ;;  %v2260_v9 = vld [vmem:[%s2234_s24 + $0x28] sm:$0xff]  ;;  %p2055_p6 = scmp.ne.s32.totalorder %s2966_s27, %s2054_s3  ;;  %s2129_s4 = smov [#allocation5]  }
  0x3c   : > { %v179_v8 = vmul.f32 %v2252_v6, %v2252_v6  ;;  %v180_v13 = vmul.f32 %v2255_v7, %v2255_v7  ;;  %v181_v15 = vmul.f32 %v2260_v9, %v2260_v9  ;;  %v2271_v16 = vld [vmem:[%s2234_s24 + $0x30] sm:$0xff]  ;;  %v2274_v17 = vld [vmem:[%s2234_s24 + $0x38] sm:$0xff]  ;;  %v2283_v22 = vld [vmem:[%s2234_s24 + $0x48] sm:$0xff]  ;;  %s2058_s5 = sshll.u32 %s2129_s4, 4  ;;  %s2059_s5 = int_to_ptr.vmem [resolvable:$false] %s2058_s5 }
  0x3d   : > { %v193_v10 = vsel %vm192_vm0, %v176_v3, 0.0  ;;  %v199_v11 = vsel %vm192_vm0, %v178_v5, 0.0  ;;  %v196_v12 = vsel %vm192_vm0, %v177_v4, 0.0  ;;  %v182_v20 = vmul.f32 %v2271_v16, %v2271_v16  ;;  %v2286_v23 = vld [vmem:[%s2234_s24 + $0x40] sm:$0xff]  ;;  %v2295_v28 = vld [vmem:[%s2234_s24 + $0x50] sm:$0xff]  ;;  %v2298_v29 = vld [vmem:[%s2234_s24 + $0x58] sm:$0xff]  ;;  %p2056_p10 = pnand %p2055_p6, %p3032_p9  ;;  %p2061_p2 = scmp.lt.s32.totalorder %s2966_s27, %s2059_s5 }
  0x3e   : > { %194 = vadd.xlane.f32.xlu0 %v193_v10  ;;  %200 = vadd.xlane.f32.xlu1 %v199_v11  ;;  %v202_v14 = vsel %vm192_vm0, %v179_v8, 0.0  ;;  %v205_v18 = vsel %vm192_vm0, %v180_v13, 0.0  ;;  %v208_v19 = vsel %vm192_vm0, %v181_v15, 0.0  ;;  %v183_v21 = vmul.f32 %v2274_v17, %v2274_v17  ;;  %v2307_v34 = vld [vmem:[%s2234_s24 + $0x60] sm:$0xff]  ;;  %v2310_v35 = vld [vmem:[%s2234_s24 + $0x68] sm:$0xff]  ;;  %v2319_v40 = vld [vmem:[%s2234_s24 + $0x78] sm:$0xff] }
  0x3f   : > { %v211_v24 = vsel %vm192_vm0, %v182_v20, 0.0  ;;  %v185_v26 = vmul.f32 %v2283_v22, %v2283_v22  ;;  %v184_v27 = vmul.f32 %v2286_v23, %v2286_v23  ;;  %v186_v32 = vmul.f32 %v2295_v28, %v2295_v28  ;;  %v2322_v41 = vld [vmem:[%s2234_s24 + $0x70] sm:$0xff]  ;;  %p2057_p12 = pneg %p2056_p10  ;;  %s2060_s6 = scalar_lea.vmem %s2059_s5, 4096 }
  0x40   : > { %v214_v25 = vsel %vm192_vm0, %v183_v21, 0.0  ;;  %v187_v33 = vmul.f32 %v2298_v29, %v2298_v29  ;;  %v188_v38 = vmul.f32 %v2307_v34, %v2307_v34  ;;  %v189_v39 = vmul.f32 %v2310_v35, %v2310_v35  ;;  %p2062_p3 = scmp.lt.s32.totalorder %s2060_s6, %s2054_s3 }
  0x41   : > { %v220_v30 = vsel %vm192_vm0, %v185_v26, 0.0  ;;  %v217_v31 = vsel %vm192_vm0, %v184_v27, 0.0  ;;  %v223_v36 = vsel %vm192_vm0, %v186_v32, 0.0  ;;  %v191_v44 = vmul.f32 %v2319_v40, %v2319_v40 }
  0x42   : > { %197 = vadd.xlane.f32.xlu0 %v196_v12  ;;  %203 = vadd.xlane.f32.xlu1 %v202_v14  ;;  %v226_v37 = vsel %vm192_vm0, %v187_v33, 0.0  ;;  %v229_v42 = vsel %vm192_vm0, %v188_v38, 0.0  ;;  %v232_v43 = vsel %vm192_vm0, %v189_v39, 0.0  ;;  %v190_v45 = vmul.f32 %v2322_v41, %v2322_v41  ;;  %v732_v38 = vld [vmem:[#allocation2 + $0x38] sm:$0xff]  ;;  %p2063_p4 = por %p2062_p3, %p2061_p2 }
  0x43   : > { %v238_v47 = vsel %vm192_vm0, %v191_v44, 0.0  ;;  %v2126_v4 = vmov 3   ;;  %v2127_v11 = vmov 1  }
  0x44   : > { %v235_v48 = vsel %vm192_vm0, %v190_v45, 0.0  ;;  %v734_v45 = vld [vmem:[#allocation2 + $0x48] sm:$0xff]  ;;  %p2064_p7 = pnand %p2063_p4, %p2057_p12 }
  0x46   : > { %206 = vadd.xlane.f32.xlu0 %v205_v18  ;;  %209 = vadd.xlane.f32.xlu1 %v208_v19  ;;  %v2128_v18 = vmov 2  }
  0x4a   : > { %212 = vadd.xlane.f32.xlu0 %v211_v24  ;;  %215 = vadd.xlane.f32.xlu1 %v214_v25  ;;  %v728_v24 = vld [vmem:[#allocation2 + $0x18] sm:$0xff] }
  0x4e   : > { %221 = vadd.xlane.f32.xlu1 %v220_v30  ;;  %218 = vadd.xlane.f32.xlu0 %v217_v31  ;;  %v730_v30 = vld [vmem:[#allocation2 + $0x28] sm:$0xff] }
  0x52   : > { %224 = vadd.xlane.f32.xlu0 %v223_v36  ;;  %227 = vadd.xlane.f32.xlu1 %v226_v37  ;;  %v731_v37 = vld [vmem:[#allocation2 + $0x30] sm:$0xff] }
  0x53   : > { %v1736_v39 = vpack.c.bf16 %v732_v38, %v731_v37  ;;  %v2470_v38 = vld [vmem:[#allocation2 + $0x8] ss:$0 sm:$0xff] }
  0x56   : > { %230 = vadd.xlane.f32.xlu0 %v229_v42  ;;  %233 = vadd.xlane.f32.xlu1 %v232_v43 }
  0x5a   : > { %239 = vadd.xlane.f32.xlu1 %v238_v47  ;;  %236 = vadd.xlane.f32.xlu0 %v235_v48 }
  0xcb   : > { %v195_v49 = vpop.xlane.xlu0 %194  ;;  %v201_v51 = vpop.xlane.xlu1 %200 }
  0xcc   : > { %v241_v50 = vmax.f32 %v195_v49, 1e-24  ;;  %v243_v60 = vmax.f32 %v201_v51, 1e-24  ;;  %v735_v51 = vld [vmem:[#allocation2 + $0x50] sm:$0xff] }
  0xce   : > { %1898 = vrsqrt.f32 %v241_v50 }
  0xcf   : > { %v198_v52 = vpop.xlane.xlu0 %197  ;;  %v204_v54 = vpop.xlane.xlu1 %203 }
  0xd0   : > { %v242_v53 = vmax.f32 %v198_v52, 1e-24  ;;  %v244_v57 = vmax.f32 %v204_v54, 1e-24  ;;  %v736_v52 = vld [vmem:[#allocation2 + $0x58] sm:$0xff] }
  0xd2   : > { %1900 = vrsqrt.f32 %v242_v53  ;;  %v1744_v53 = vpack.c.bf16 %v736_v52, %v735_v51 }
  0xd3   : > { %v207_v55 = vpop.xlane.xlu0 %206  ;;  %v210_v58 = vpop.xlane.xlu1 %209 }
  0xd4   : > { %v245_v56 = vmax.f32 %v207_v55, 1e-24  ;;  %v246_v62 = vmax.f32 %v210_v58, 1e-24  ;;  %v738_v58 = vld [vmem:[#allocation2 + $0x68] sm:$0xff] }
  0xd6   : > { %1902 = vrsqrt.f32 %v245_v56 }
  0xd7   : > { %1904 = vrsqrt.f32 %v244_v57  ;;  %v2346_v12 = vpop.xlane.xlu1 %215  ;;  %v737_v57 = vld [vmem:[#allocation2 + $0x60] sm:$0xff] }
  0xd8   : > { %v1899_v59 = vpop.eup %1898  ;;  %1906 = vrsqrt.f32 %v243_v60 }
  0xd9   : > { %v273_v61 = vmul.f32 %v1899_v59, %v2237_v0  ;;  %1908 = vrsqrt.f32 %v246_v62  ;;  %v213_v0 = vpop.xlane.xlu0 %212  ;;  %v1748_v59 = vpack.c.bf16 %v738_v58, %v737_v57  ;;  %v740_v62 = vld [vmem:[#allocation2 + $0x78] sm:$0xff] }
  0xdb   : > { %293 = vperm.xlu0 %1850, %v273_v61   ;;  %v222_v21 = vpop.xlane.xlu1 %221 }
  0xdc   : > { %v1901_v63 = vpop.eup %1900 }
  0xdd   : > { %v2336_v3 = vmul.f32 %v1901_v63, %v2240_v1  ;;  %v247_v1 = vmax.f32 %v213_v0, 1e-24  ;;  %v2356_v19 = vpop.xlane.xlu0 %218 }
  0xdf   : > { %1858 = vset.pattern.permute.xlu0 %v2126_v4  ;;  %298 = vperm.xlu1 %1851, %v2336_v3   ;;  %1910 = vrsqrt.f32 %v247_v1  ;;  %v228_v27 = vpop.xlane.xlu1 %227 }
  0xe0   : > { %v1903_v5 = vpop.eup %1902  ;;  %612 = vperm.xlu0 %1858, %v273_v61   ;;  %v252_v42 = vmax.f32 %v228_v27, 1e-24 }
  0xe1   : > { %v2341_v8 = vmul.f32 %v1903_v5, %v2255_v7  ;;  %v1905_v10 = vpop.eup %1904  ;;  %v225_v26 = vpop.xlane.xlu0 %224 }
  0xe2   : > { %v1907_v13 = vpop.eup %1906  ;;  %v2349_v14 = vmul.f32 %v1905_v10, %v2252_v6  ;;  %v727_v6 = vld [vmem:[#allocation2 + $0x10] sm:$0xff]  ;;  %v251_v32 = vmax.f32 %v225_v26, 1e-24  ;;  %v742_v10 = vld [vmem:[#allocation2 + $0x88] sm:$0xff] }
  0xe3   : > { %1852 = vset.pattern.permute.xlu1 %v2127_v11  ;;  %v1909_v15 = vpop.eup %1908  ;;  %v2353_v7 = vmul.f32 %v1907_v13, %v2243_v2  ;;  %v250_v2 = vmax.f32 %v222_v21, 1e-24  ;;  %v1728_v25 = vpack.c.bf16 %v728_v24, %v727_v6  ;;  %v2374_v43 = vpop.xlane.xlu1 %233 }
  0xe4   : > { %412 = vperm.xlu1 %1852, %v273_v61   ;;  %1860 = vset.pattern.permute.xlu0 %v2125_v46  ;;  %v2360_v20 = vmul.f32 %v1909_v15, %v2260_v9  ;;  %v729_v9 = vld [vmem:[#allocation2 + $0x20] sm:$0xff]  ;;  %v254_v24 = vmax.f32 %v2374_v43, 1e-24 }
  0xe5   : > { %313 = vperm.xlu0 %1860, %v2341_v8   ;;  %1729 = vmatprep.subr.bf16.mxu0 %v1728_v25  ;;  %1912 = vrsqrt.f32 %v250_v2  ;;  %v1732_v33 = vpack.c.bf16 %v730_v30, %v729_v9  ;;  %v231_v44 = vpop.xlane.xlu0 %230 }
  0xe6   : > { %1731 = vmatpush3.bf16.msra.mxu0 %v1728_v25  ;;  %1914 = vrsqrt.f32 %v251_v32  ;;  %v253_v48 = vmax.f32 %v231_v44, 1e-24  ;;  %v289_v25 = vld [vmem:[#allocation2] sm:$0xf] }
  0xe7   : > { %1733 = vmatprep.subr.bf16.mxu0 %v1732_v33  ;;  %1916 = vrsqrt.f32 %v252_v42  ;;  %v240_v50 = vpop.xlane.xlu1 %239 }
  0xe8   : > { %416 = vperm.xlu1 %1852, %v2336_v3   ;;  %1918 = vrsqrt.f32 %v253_v48  ;;  %v256_v56 = vmax.f32 %v240_v50, 1e-24 }
  0xe9   : > { %1863 = vset.pattern.permute.xlu0 %v2128_v18  ;;  %v1911_v31 = vpop.eup %1910 }
  0xea   : > { %524 = vperm.xlu0 %1863, %v2349_v14   ;;  %v2370_v36 = vmul.f32 %v1911_v31, %v2271_v16  ;;  %1735 = vmatpush3.bf16.msra.mxu0 %v1732_v33  ;;  %v733_v16 = vld [vmem:[#allocation2 + $0x40] sm:$0xff]  ;;  %1920 = vrsqrt.f32 %v256_v56 }
  0xeb   : > { %1737 = vmatprep.subr.bf16.mxu0 %v1736_v39  ;;  %v1740_v47 = vpack.c.bf16 %v734_v45, %v733_v16 }
  0xec   : > { %1853 = vset.pattern.permute.xlu1 %v2125_v46 }
  0xed   : > { %303 = vperm.xlu1 %1853, %v2353_v7  }
  0xee   : > { %1866 = vset.pattern.permute.xlu0 %v2127_v11  ;;  %1739 = vmatpush3.bf16.msra.mxu0 %v1736_v39 }
  0xef   : > { %432 = vperm.xlu0 %1866, %v2360_v20   ;;  %v1913_v49 = vpop.eup %1912  ;;  %1741 = vmatprep.subr.bf16.mxu0 %v1740_v47 }
  0xf0   : > { %v2383_v54 = vmul.f32 %v1913_v49, %v2283_v22  ;;  %v1915_v55 = vpop.eup %1914 }
  0xf1   : > { %1854 = vset.pattern.permute.xlu1 %v2128_v18  ;;  %v2390_v60 = vmul.f32 %v1915_v55, %v2295_v28  ;;  %v1917_v22 = vpop.eup %1916  ;;  %v741_v28 = vld [vmem:[#allocation2 + $0x80] sm:$0xff] }
  0xf2   : > { %512 = vperm.xlu1 %1854, %v273_v61   ;;  %1743 = vmatpush3.bf16.msra.mxu0 %v1740_v47  ;;  %v739_v61 = vld [vmem:[#allocation2 + $0x70] sm:$0xff]  ;;  %v2395_v5 = vmul.f32 %v1917_v22, %v2298_v29  ;;  %v1919_v0 = vpop.eup %1918  ;;  %v1756_v1 = vpack.c.bf16 %v742_v10, %v741_v28 }
  0xf3   : > { %1868 = vset.pattern.permute.xlu0 %v2128_v18  ;;  %1745 = vmatprep.subr.bf16.mxu0 %v1744_v53  ;;  %v1752_v63 = vpack.c.bf16 %v740_v62, %v739_v61  ;;  %v2402_v13 = vmul.f32 %v1919_v0, %v2307_v34  ;;  %v248_v34 = vmax.f32 %v2346_v12, 1e-24 }
  0xf4   : > { %528 = vperm.xlu0 %1868, %v2341_v8   ;;  %v1921_v29 = vpop.eup %1920 }
  0xf5   : > { %v2408_v15 = vmul.f32 %v1921_v29, %v2319_v40  ;;  %1922 = vrsqrt.f32 %v248_v34 }
  0xf6   : > { %1855 = vset.pattern.permute.xlu1 %v2125_v46  ;;  %1747 = vmatpush3.bf16.msra.mxu0 %v1744_v53 }
  0xf7   : > { %308 = vperm.xlu1 %1855, %v2349_v14   ;;  %1749 = vmatprep.subr.bf16.mxu0 %v1748_v59 }
  0xf8   : > { %1870 = vset.pattern.permute.xlu0 %v2127_v11 }
  0xf9   : > { %436 = vperm.xlu0 %1870, %v2370_v36  }
  0xfa   : > { %1751 = vmatpush3.bf16.msra.mxu0 %v1748_v59 }
  0xfb   : > { %1856 = vset.pattern.permute.xlu1 %v2128_v18  ;;  %1753 = vmatprep.subr.bf16.mxu0 %v1752_v63 }
  0xfc   : > { %516 = vperm.xlu1 %1856, %v2336_v3  }
  0xfd   : > { %1873 = vset.pattern.permute.xlu0 %v2126_v4 }
  0xfe   : > { %632 = vperm.xlu0 %1873, %v2360_v20   ;;  %1755 = vmatpush3.bf16.msra.mxu0 %v1752_v63 }
  0xff   : > { %1757 = vmatprep.subr.bf16.mxu0 %v1756_v1  ;;  %v1923_v12 = vpop.eup %1922 }
 0x100   : > { %1857 = vset.pattern.permute.xlu1 %v2127_v11  ;;  %v280_v21 = vmul.f32 %v1923_v12, %v2274_v17 }
 0x101   : > { %420 = vperm.xlu1 %1857, %v2353_v7  }
 0x102   : > { %1876 = vset.pattern.permute.xlu0 %v2125_v46  ;;  %1759 = vmatpush3.bf16.msra.mxu0 %v1756_v1 }
 0x103   : > { %338 = vperm.xlu0 %1876, %v2383_v54  }
 0x105   : > { %424 = vperm.xlu1 %1857, %v2349_v14  }
 0x107   : > { %343 = vperm.xlu0 %1876, %v2390_v60  }
 0x109   : > { %1859 = vset.pattern.permute.xlu1 %v2126_v4 }
 0x10a   : > { %616 = vperm.xlu1 %1859, %v2336_v3   ;;  %v237_v3 = vpop.xlane.xlu0 %236 }
 0x10b   : > { %1883 = vset.pattern.permute.xlu0 %v2127_v11  ;;  %v255_v40 = vmax.f32 %v237_v3, 1e-24 }
 0x10c   : > { %456 = vperm.xlu0 %1883, %v2395_v5  }
 0x10d   : > { %1924 = vrsqrt.f32 %v255_v40 }
 0x10e   : > { %1861 = vset.pattern.permute.xlu1 %v2128_v18 }
 0x10f   : > { %520 = vperm.xlu1 %1861, %v2353_v7  }
 0x110   : > { %460 = vperm.xlu0 %1883, %v2402_v13  }
 0x113   : > { %1862 = vset.pattern.permute.xlu1 %v2125_v46 }
 0x114   : > { %318 = vperm.xlu1 %1862, %v2360_v20   ;;  %1890 = vset.pattern.permute.xlu0 %v2125_v46 }
 0x115   : > { %368 = vperm.xlu0 %1890, %v2408_v15  }
 0x117   : > { %v1925_v6 = vpop.eup %1924 }
 0x118   : > { %1864 = vset.pattern.permute.xlu1 %v2127_v11 }
 0x119   : > { %428 = vperm.xlu1 %1864, %v2341_v8   ;;  %1891 = vset.pattern.permute.xlu0 %v2126_v4 }
 0x11a   : > { %636 = vperm.xlu0 %1891, %v2370_v36  }
 0x11d   : > { %1865 = vset.pattern.permute.xlu1 %v2126_v4 }
 0x11e   : > { %620 = vperm.xlu1 %1865, %v2353_v7   ;;  %656 = vperm.xlu0 %1891, %v2395_v5   ;;  %v249_v7 = vmax.f32 %v2356_v19, 1e-24 }
 0x120   : > { %1926 = vrsqrt.f32 %v249_v7 }
 0x121   : > { %1928 = vrsqrt.f32 %v254_v24 }
 0x122   : > { %624 = vperm.xlu1 %1865, %v2349_v14   ;;  %660 = vperm.xlu0 %1891, %v2402_v13   ;;  %v2432_v14 = vmul.f32 %v1925_v6, %v2322_v41 }
 0x126   : > { %1867 = vset.pattern.permute.xlu1 %v2125_v46  ;;  %1893 = vset.pattern.permute.xlu0 %v2128_v18 }
 0x127   : > { %323 = vperm.xlu1 %1867, %v2370_v36   ;;  %548 = vperm.xlu0 %1893, %v2383_v54  }
 0x12a   : > { %v1927_v17 = vpop.eup %1926 }
 0x12b   : > { %328 = vperm.xlu1 %1867, %v280_v21   ;;  %552 = vperm.xlu0 %1893, %v2390_v60   ;;  %v281_v41 = vmul.f32 %v1927_v17, %v2286_v23  ;;  %v371_v23 = vlaneseq  ;;  %v1929_v47 = vpop.eup %1928 }
 0x12c   : > { %v286_v52 = vmul.f32 %v1929_v47, %v2310_v35 }
 0x12d   : > { %v2452_v19 = vshrl.u32 %v371_v23, 7 }
 0x12f   : > { %1869 = vset.pattern.permute.xlu1 %v2128_v18  ;;  %568 = vperm.xlu0 %1893, %v2432_v14   ;;  %v373_v2 = vsub.s32 0, %v2452_v19  ;;  %v477_v26 = vsub.s32 1, %v2452_v19  ;;  %v577_v32 = vsub.s32 2, %v2452_v19 }
 0x130   : > { %532 = vperm.xlu1 %1869, %v2360_v20  }
 0x131   : > { %v2462_v9 = vrot.slane %v289_v25, %v373_v2  ;;  %v2465_v31 = vrot.slane %v289_v25, %v477_v26  ;;  %v2474_v42 = vrot.slane %v289_v25, %v577_v32 }
 0x133   : > { %1897 = vset.pattern.permute.xlu0 %v2126_v4 }
 0x134   : > { %1871 = vset.pattern.permute.xlu1 %v2126_v4  ;;  %672 = vperm.xlu0 %1897, %v2408_v15  }
 0x135   : > { %628 = vperm.xlu1 %1871, %v2341_v8  }
 0x139   : > { %1872 = vset.pattern.permute.xlu1 %v2127_v11 }
 0x13a   : > { %440 = vperm.xlu1 %1872, %v280_v21  }
 0x13e   : > { %1874 = vset.pattern.permute.xlu1 %v2125_v46 }
 0x13f   : > { %333 = vperm.xlu1 %1874, %v281_v41  }
 0x143   : > { %1875 = vset.pattern.permute.xlu1 %v2128_v18 }
 0x144   : > { %536 = vperm.xlu1 %1875, %v2370_v36   ;;  %v677_v36 = vsub.s32 3, %v2452_v19 }
 0x146   : > { %v2477_v44 = vrot.slane %v289_v25, %v677_v36 }
 0x148   : > { %540 = vperm.xlu1 %1875, %v280_v21  }
 0x14c   : > { %1877 = vset.pattern.permute.xlu1 %v2127_v11 }
 0x14d   : > { %444 = vperm.xlu1 %1877, %v281_v41  }
 0x151   : > { %448 = vperm.xlu1 %1877, %v2383_v54  }
 0x155   : > { %1878 = vset.pattern.permute.xlu1 %v2126_v4 }
 0x156   : > { %640 = vperm.xlu1 %1878, %v280_v21  }
 0x15a   : > { %1879 = vset.pattern.permute.xlu1 %v2128_v18  ;;  %v294_v30 = vpop.permute.xlu0 %293 }
 0x15b   : > { %544 = vperm.xlu1 %1879, %v281_v41   ;;  %v375_v33 = vmul.f32 %v2462_v9, %v294_v30 }
 0x15d   : > { %v395_v43 = vadd.f32 %v2470_v38, %v375_v33 }
 0x15e   : > { %v299_v8 = vpop.permute.xlu1 %298 }
 0x15f   : > { %1880 = vset.pattern.permute.xlu1 %v2125_v46  ;;  %v613_v16 = vpop.permute.xlu0 %612  ;;  %v376_v58 = vmul.f32 %v2462_v9, %v299_v8 }
 0x160   : > { %348 = vperm.xlu1 %1880, %v2395_v5   ;;  %v679_v50 = vmul.f32 %v2477_v44, %v613_v16 }
 0x161   : > { %v396_v61 = vadd.f32 %v2470_v38, %v376_v58 }
 0x163   : > { %v413_v20 = vpop.permute.xlu1 %412 }
 0x164   : > { %1881 = vset.pattern.permute.xlu1 %v2127_v11  ;;  %v479_v39 = vmul.f32 %v2465_v31, %v413_v20  ;;  %v314_v59 = vpop.permute.xlu0 %313 }
 0x165   : > { %452 = vperm.xlu1 %1881, %v2390_v60  }
 0x166   : > { %v495_v48 = vadd.f32 %v479_v39, %v395_v43 }
 0x167   : > { %v417_v27 = vpop.permute.xlu1 %416 }
 0x168   : > { %v480_v35 = vmul.f32 %v2465_v31, %v417_v27 }
 0x169   : > { %1882 = vset.pattern.permute.xlu1 %v2126_v4 }
 0x16a   : > { %644 = vperm.xlu1 %1882, %v281_v41   ;;  %v496_v63 = vadd.f32 %v480_v35, %v396_v61  ;;  %v909_v35 = vld [vmem:[#allocation2 + $0x98] sm:$0xff]  ;;  %v911_v61 = vld [vmem:[#allocation2 + $0xa8] sm:$0xff] }
 0x16c   : > { %v304_v37 = vpop.permute.xlu1 %303 }
 0x16d   : > { %v377_v12 = vmul.f32 %v2462_v9, %v304_v37 }
 0x16e   : > { %648 = vperm.xlu1 %1882, %v2383_v54  }
 0x16f   : > { %v397_v17 = vadd.f32 %v2470_v38, %v377_v12 }
 0x171   : > { %v513_v45 = vpop.permute.xlu1 %512 }
 0x172   : > { %v579_v49 = vmul.f32 %v2474_v42, %v513_v45  ;;  %1884 = vset.pattern.permute.xlu1 %v2125_v46 }
 0x173   : > { %353 = vperm.xlu1 %1884, %v2402_v13  }
 0x174   : > { %v595_v51 = vadd.f32 %v579_v49, %v495_v48  ;;  %v379_v49 = vmul.f32 %v2462_v9, %v314_v59 }
 0x176   : > { %v309_v53 = vpop.permute.xlu1 %308  ;;  %v695_v54 = vadd.f32 %v679_v50, %v595_v51 }
 0x177   : > { %358 = vperm.xlu1 %1884, %v286_v52   ;;  %v378_v21 = vmul.f32 %v2462_v9, %v309_v53 }
 0x178   : > { %v711_v55 = vmax.f32 %v695_v54, 0.0 }
 0x179   : > { %v398_v8 = vadd.f32 %v2470_v38, %v378_v21 }
 0x17a   : > { %1648 = vmatprep.mubr.f32.mxu0 %v711_v55 }
 0x17b   : > { %v517_v56 = vpop.permute.xlu1 %516  ;;  %1885 = vset.pattern.permute.xlu1 %v2128_v18 }
 0x17c   : > { %556 = vperm.xlu1 %1885, %v2395_v5   ;;  %v580_v62 = vmul.f32 %v2474_v42, %v517_v56  ;;  %v525_v5 = vpop.permute.xlu0 %524 }
 0x17d   : > { %v582_v30 = vmul.f32 %v2474_v42, %v525_v5  ;;  %v912_v5 = vld [vmem:[#allocation2 + $0xb0] sm:$0xff] }
 0x17e   : > { %v596_v28 = vadd.f32 %v580_v62, %v496_v63 }
 0x180   : > { %v421_v57 = vpop.permute.xlu1 %420  ;;  %1886 = vset.pattern.permute.xlu1 %v2126_v4  ;;  %v433_v1 = vpop.permute.xlu0 %432 }
 0x181   : > { %652 = vperm.xlu1 %1886, %v2390_v60  }
 0x184   : > { %v425_v22 = vpop.permute.xlu1 %424  ;;  %v529_v3 = vpop.permute.xlu0 %528 }
 0x185   : > { %1887 = vset.pattern.permute.xlu1 %v2127_v11 }
 0x186   : > { %464 = vperm.xlu1 %1887, %v286_v52  }
 0x188   : > { %v2502_v7 = vpop.permute.xlu0 %436 }
 0x189   : > { %v617_v0 = vpop.permute.xlu1 %616 }
 0x18a   : > { %v680_v10 = vmul.f32 %v2477_v44, %v617_v0  ;;  %1888 = vset.pattern.permute.xlu1 %v2125_v46  ;;  %v481_v46 = vmul.f32 %v2465_v31, %v421_v57 }
 0x18b   : > { %363 = vperm.xlu1 %1888, %v2432_v14  }
 0x18c   : > { %v696_v60 = vadd.f32 %v680_v10, %v596_v28  ;;  %v497_v20 = vadd.f32 %v481_v46, %v397_v17  ;;  %v633_v27 = vpop.permute.xlu0 %632  ;;  %v1764_v10 = vpack.c.bf16 %v912_v5, %v911_v61  ;;  %v915_v46 = vld [vmem:[#allocation2 + $0xc8] sm:$0xff] }
 0x18e   : > { %v521_v29 = vpop.permute.xlu1 %520  ;;  %v712_v34 = vmax.f32 %v696_v60, 0.0  ;;  %v913_v60 = vld [vmem:[#allocation2 + $0xb8] sm:$0xff] }
 0x18f   : > { %1889 = vset.pattern.permute.xlu1 %v2128_v18  ;;  %v581_v41 = vmul.f32 %v2474_v42, %v521_v29 }
 0x190   : > { %560 = vperm.xlu1 %1889, %v2402_v13   ;;  %1649 = vmatmul.mubr.f32.vlgmr.msra.gmra.mrb[0].mxu0 %v712_v34  ;;  %v482_v13 = vmul.f32 %v2465_v31, %v425_v22  ;;  %v2514_v16 = vpop.permute.xlu0 %338  ;;  %v910_v22 = vld [vmem:[#allocation2 + $0xa0] sm:$0xff] }
 0x191   : > { %v597_v26 = vadd.f32 %v581_v41, %v497_v20  ;;  %v1760_v63 = vpack.c.bf16 %v910_v22, %v909_v35  ;;  %v917_v20 = vld [vmem:[#allocation2 + $0xd8] sm:$0xff] }
 0x192   : > { %v498_v25 = vadd.f32 %v482_v13, %v398_v8 }
 0x193   : > { %v319_v40 = vpop.permute.xlu1 %318  ;;  %1761 = vmatprep.subr.bf16.mxu1 %v1760_v63 }
 0x194   : > { %564 = vperm.xlu1 %1889, %v286_v52   ;;  %v598_v36 = vadd.f32 %v582_v30, %v498_v25  ;;  %v380_v48 = vmul.f32 %v2462_v9, %v319_v40  ;;  %v2522_v51 = vpop.permute.xlu0 %343  ;;  %1763 = vmatpush3.bf16.msra.mxu1 %v1760_v63  ;;  %v920_v30 = vld [vmem:[#allocation2 + $0xf0] sm:$0xff] }
 0x195   : > { %1765 = vmatprep.subr.bf16.mxu1 %v1764_v10 }
 0x198   : > { %v429_v6 = vpop.permute.xlu1 %428  ;;  %1892 = vset.pattern.permute.xlu1 %v2127_v11  ;;  %v2531_v58 = vpop.permute.xlu0 %456  ;;  %1767 = vmatpush3.bf16.msra.mxu1 %v1764_v10 }
 0x199   : > { %468 = vperm.xlu1 %1892, %v2432_v14   ;;  %v483_v53 = vmul.f32 %v2465_v31, %v429_v6  ;;  %v916_v6 = vld [vmem:[#allocation2 + $0xd0] sm:$0xff] }
 0x19a   : > { %v1772_v41 = vpack.c.bf16 %v916_v6, %v915_v46 }
 0x19c   : > { %v2536_v34 = vpop.permute.xlu0 %460 }
 0x19d   : > { %v621_v24 = vpop.permute.xlu1 %620  ;;  %472 = vperm.xlu1 %1892, %v2408_v15  }
 0x19e   : > { %v681_v11 = vmul.f32 %v2477_v44, %v621_v24  ;;  %v918_v24 = vld [vmem:[#allocation2 + $0xe0] sm:$0xff] }
 0x1a0   : > { %v697_v32 = vadd.f32 %v681_v11, %v597_v26  ;;  %v2539_v8 = vpop.permute.xlu0 %368  ;;  %v1776_v11 = vpack.c.bf16 %v918_v24, %v917_v20 }
 0x1a1   : > { %v625_v33 = vpop.permute.xlu1 %624  ;;  %1894 = vset.pattern.permute.xlu1 %v2126_v4 }
 0x1a2   : > { %v682_v37 = vmul.f32 %v2477_v44, %v625_v33  ;;  %664 = vperm.xlu1 %1894, %v286_v52   ;;  %v713_v39 = vmax.f32 %v697_v32, 0.0  ;;  %v400_v52 = vadd.f32 %v2470_v38, %v380_v48  ;;  %v485_v32 = vmul.f32 %v2465_v31, %v2502_v7 }
 0x1a4   : > { %v698_v43 = vadd.f32 %v682_v37, %v598_v36  ;;  %1651 = vmatprep.mubr.f32.mxu0 %v713_v39  ;;  %v637_v33 = vpop.permute.xlu0 %636 }
 0x1a5   : > { %v685_v48 = vmul.f32 %v2477_v44, %v637_v33 }
 0x1a6   : > { %v324_v45 = vpop.permute.xlu1 %323  ;;  %1895 = vset.pattern.permute.xlu1 %v2128_v18  ;;  %v714_v47 = vmax.f32 %v698_v43, 0.0  ;;  %v399_v18 = vadd.f32 %v2470_v38, %v379_v49 }
 0x1a7   : > { %572 = vperm.xlu1 %1895, %v2408_v15   ;;  %v484_v15 = vmul.f32 %v2465_v31, %v433_v1  ;;  %v914_v1 = vld [vmem:[#allocation2 + $0xc0] sm:$0xff]  ;;  %v381_v13 = vmul.f32 %v2462_v9, %v324_v45  ;;  %v921_v45 = vld [vmem:[#allocation2 + $0xf8] sm:$0xff] }
 0x1a8   : > { %1652 = vmatmul.mubr.f32.gmra.mrb[2].mxu0 %v714_v47  ;;  %v499_v57 = vadd.f32 %v483_v53, %v399_v18  ;;  %v922_v47 = vld [vmem:[#allocation2 + $0x100] sm:$0xff]  ;;  %v657_v5 = vpop.permute.xlu0 %656 }
 0x1a9   : > { %v500_v55 = vadd.f32 %v484_v15, %v400_v52  ;;  %v401_v26 = vadd.f32 %v2470_v38, %v381_v13  ;;  %v1784_v53 = vpack.c.bf16 %v922_v47, %v921_v45 }
 0x1aa   : > { %v2520_v50 = vpop.permute.xlu1 %328 }
 0x1ab   : > { %1896 = vset.pattern.permute.xlu1 %v2126_v4  ;;  %v583_v4 = vmul.f32 %v2474_v42, %v529_v3  ;;  %v1768_v3 = vpack.c.bf16 %v914_v1, %v913_v60  ;;  %v501_v37 = vadd.f32 %v485_v32, %v401_v26  ;;  %v923_v60 = vld [vmem:[#allocation2 + $0x108] sm:$0xff]  ;;  %v924_v1 = vld [vmem:[#allocation2 + $0x110] sm:$0xff] }
 0x1ac   : > { %668 = vperm.xlu1 %1896, %v2432_v14   ;;  %v684_v14 = vmul.f32 %v2477_v44, %v633_v27  ;;  %v919_v27 = vld [vmem:[#allocation2 + $0xe8] sm:$0xff]  ;;  %v661_v10 = vpop.permute.xlu0 %660 }
 0x1ad   : > { %v599_v0 = vadd.f32 %v583_v4, %v499_v57  ;;  %1769 = vmatprep.subr.bf16.mxu1 %v1768_v3  ;;  %v1780_v43 = vpack.c.bf16 %v920_v30, %v919_v27 }
 0x1ae   : > { %1771 = vmatpush3.bf16.msra.mxu1 %v1768_v3  ;;  %v1788_v3 = vpack.c.bf16 %v924_v1, %v923_v60  ;;  %v691_v1 = vmul.f32 %v2477_v44, %v661_v10 }
 0x1af   : > { %v533_v54 = vpop.permute.xlu1 %532  ;;  %1773 = vmatprep.subr.bf16.mxu1 %v1772_v41 }
 0x1b0   : > { %v584_v56 = vmul.f32 %v2474_v42, %v533_v54  ;;  %v382_v54 = vmul.f32 %v2462_v9, %v2520_v50  ;;  %v384_v50 = vmul.f32 %v2462_v9, %v2514_v16 }
 0x1b2   : > { %v600_v59 = vadd.f32 %v584_v56, %v500_v55  ;;  %1775 = vmatpush3.bf16.msra.mxu1 %v1772_v41  ;;  %v402_v57 = vadd.f32 %v2470_v38, %v382_v54 }
 0x1b3   : > { %1777 = vmatprep.subr.bf16.mxu1 %v1776_v11 }
 0x1b4   : > { %v629_v62 = vpop.permute.xlu1 %628  ;;  %v700_v29 = vadd.f32 %v684_v14, %v600_v59 }
 0x1b5   : > { %v683_v28 = vmul.f32 %v2477_v44, %v629_v62 }
 0x1b6   : > { %v716_v17 = vmax.f32 %v700_v29, 0.0  ;;  %1779 = vmatpush3.bf16.msra.mxu1 %v1776_v11 }
 0x1b7   : > { %v699_v40 = vadd.f32 %v683_v28, %v599_v0  ;;  %1781 = vmatprep.subr.bf16.mxu1 %v1780_v43 }
 0x1b9   : > { %v441_v12 = vpop.permute.xlu1 %440  ;;  %v715_v21 = vmax.f32 %v699_v40, 0.0 }
 0x1ba   : > { %1783 = vmatpush3.bf16.msra.mxu1 %v1780_v43  ;;  %v486_v55 = vmul.f32 %v2465_v31, %v441_v12  ;;  %v404_v12 = vadd.f32 %v2470_v38, %v384_v50  ;;  %v385_v43 = vmul.f32 %v2462_v9, %v2522_v51  ;;  %v690_v51 = vmul.f32 %v2477_v44, %v657_v5 }
 0x1bb   : > { %1654 = vmatprep.mubr.f32.mxu0 %v715_v21  ;;  %1785 = vmatprep.subr.bf16.mxu1 %v1784_v53  ;;  %v491_v50 = vmul.f32 %v2465_v31, %v2536_v34 }
 0x1bc   : > { %1655 = vmatmul.mubr.f32.gmra.mrb[4].mxu0 %v716_v17  ;;  %v502_v4 = vadd.f32 %v486_v55, %v402_v57  ;;  %v549_v17 = vpop.permute.xlu0 %548 }
 0x1be   : > { %v334_v25 = vpop.permute.xlu1 %333  ;;  %1787 = vmatpush3.bf16.msra.mxu1 %v1784_v53 }
 0x1bf   : > { %v383_v28 = vmul.f32 %v2462_v9, %v334_v25  ;;  %1789 = vmatprep.subr.bf16.mxu1 %v1788_v3  ;;  %v588_v25 = vmul.f32 %v2474_v42, %v549_v17 }
 0x1c0   : > { %v553_v54 = vpop.permute.xlu0 %552 }
 0x1c1   : > { %v403_v21 = vadd.f32 %v2470_v38, %v383_v28 }
 0x1c2   : > { %1791 = vmatpush3.bf16.msra.mxu1 %v1788_v3 }
 0x1c3   : > { %v537_v36 = vpop.permute.xlu1 %536 }
 0x1c4   : > { %v585_v39 = vmul.f32 %v2474_v42, %v537_v36 }
 0x1c6   : > { %v601_v49 = vadd.f32 %v585_v39, %v501_v37 }
 0x1c7   : > { %v541_v52 = vpop.permute.xlu1 %540 }
 0x1c8   : > { %v701_v18 = vadd.f32 %v685_v48, %v601_v49  ;;  %v586_v59 = vmul.f32 %v2474_v42, %v541_v52  ;;  %v405_v48 = vadd.f32 %v2470_v38, %v385_v43  ;;  %v490_v52 = vmul.f32 %v2465_v31, %v2531_v58 }
 0x1ca   : > { %v717_v15 = vmax.f32 %v701_v18, 0.0  ;;  %v602_v22 = vadd.f32 %v586_v59, %v502_v4 }
 0x1cc   : > { %v445_v7 = vpop.permute.xlu1 %444  ;;  %1657 = vmatprep.mubr.f32.mxu0 %v717_v15 }
 0x1cd   : > { %v487_v29 = vmul.f32 %v2465_v31, %v445_v7 }
 0x1cf   : > { %v503_v16 = vadd.f32 %v487_v29, %v403_v21 }
 0x1d0   : > { %v449_v56 = vpop.permute.xlu1 %448 }
 0x1d1   : > { %v488_v46 = vmul.f32 %v2465_v31, %v449_v56  ;;  %v589_v56 = vmul.f32 %v2474_v42, %v553_v54 }
 0x1d3   : > { %v504_v41 = vadd.f32 %v488_v46, %v404_v12 }
 0x1d5   : > { %v641_v35 = vpop.permute.xlu1 %640  ;;  %v604_v27 = vadd.f32 %v588_v25, %v504_v41  ;;  %v390_v41 = vmul.f32 %v2462_v9, %v2539_v8 }
 0x1d6   : > { %v686_v61 = vmul.f32 %v2477_v44, %v641_v35 }
 0x1d8   : > { %v702_v14 = vadd.f32 %v686_v61, %v602_v22 }
 0x1da   : > { %v718_v62 = vmax.f32 %v702_v14, 0.0  ;;  %v545_v63 = vpop.permute.xlu1 %544 }
 0x1db   : > { %v587_v6 = vmul.f32 %v2474_v42, %v545_v63 }
 0x1dc   : > { %1658 = vmatmul.mubr.f32.gmra.mrb[6].mxu0 %v718_v62 }
 0x1dd   : > { %v603_v20 = vadd.f32 %v587_v6, %v503_v16 }
 0x1df   : > { %v349_v0 = vpop.permute.xlu1 %348 }
 0x1e0   : > { %v386_v39 = vmul.f32 %v2462_v9, %v349_v0 }
 0x1e2   : > { %v406_v47 = vadd.f32 %v2470_v38, %v386_v39 }
 0x1e4   : > { %v453_v40 = vpop.permute.xlu1 %452  ;;  %v506_v53 = vadd.f32 %v490_v52, %v406_v47 }
 0x1e5   : > { %v489_v49 = vmul.f32 %v2465_v31, %v453_v40 }
 0x1e7   : > { %v505_v7 = vadd.f32 %v489_v49, %v405_v48 }
 0x1e9   : > { %v645_v13 = vpop.permute.xlu1 %644  ;;  %v605_v59 = vadd.f32 %v589_v56, %v505_v7  ;;  %v1543_v7 = vld [vmem:[#allocation2 + $0x90] ss:$0 sm:$0xff] }
 0x1ea   : > { %v687_v24 = vmul.f32 %v2477_v44, %v645_v13 }
 0x1ec   : > { %v703_v26 = vadd.f32 %v687_v24, %v603_v20  ;;  %v569_v20 = vpop.permute.xlu0 %568 }
 0x1ed   : > { %v649_v11 = vpop.permute.xlu1 %648  ;;  %v593_v47 = vmul.f32 %v2474_v42, %v569_v20 }
 0x1ee   : > { %v719_v30 = vmax.f32 %v703_v26, 0.0  ;;  %v688_v32 = vmul.f32 %v2477_v44, %v649_v11 }
 0x1f0   : > { %v704_v33 = vadd.f32 %v688_v32, %v604_v27  ;;  %1660 = vmatprep.mubr.f32.mxu0 %v719_v30  ;;  %v410_v32 = vadd.f32 %v2470_v38, %v390_v41  ;;  %v673_v43 = vpop.permute.xlu0 %672 }
 0x1f1   : > { %v694_v48 = vmul.f32 %v2477_v44, %v673_v43  ;;  %v2598_v43 = vand.u32 127, %v371_v23 }
 0x1f2   : > { %v720_v36 = vmax.f32 %v704_v33, 0.0  ;;  %v354_v37 = vpop.permute.xlu1 %353 }
 0x1f3   : > { %v387_v62 = vmul.f32 %v2462_v9, %v354_v37  ;;  %vm1077_vm1 = vcmp.lt.s32.totalorder %v2598_v43, 2  ;;  %vm1412_vm3 = vcmp.eq.s32.totalorder %v2598_v43, 2 }
 0x1f4   : > { %1661 = vmatmul.mubr.f32.gmra.mrb[8].mxu0 %v720_v36 }
 0x1f5   : > { %v407_v0 = vadd.f32 %v2470_v38, %v387_v62 }
 0x1f6   : > { %v359_v45 = vpop.permute.xlu1 %358 }
 0x1f7   : > { %v507_v28 = vadd.f32 %v491_v50, %v407_v0  ;;  %v388_v46 = vmul.f32 %v2462_v9, %v359_v45 }
 0x1f9   : > { %v408_v17 = vadd.f32 %v2470_v38, %v388_v46 }
 0x1fb   : > { %v557_v18 = vpop.permute.xlu1 %556 }
 0x1fc   : > { %v590_v15 = vmul.f32 %v2474_v42, %v557_v18 }
 0x1fe   : > { %v606_v55 = vadd.f32 %v590_v15, %v506_v53 }
 0x200   : > { %v653_v57 = vpop.permute.xlu1 %652  ;;  %v706_v35 = vadd.f32 %v690_v51, %v606_v55 }
 0x201   : > { %v689_v4 = vmul.f32 %v2477_v44, %v653_v57 }
 0x202   : > { %v722_v58 = vmax.f32 %v706_v35, 0.0 }
 0x203   : > { %v705_v22 = vadd.f32 %v689_v4, %v605_v59 }
 0x205   : > { %v721_v61 = vmax.f32 %v705_v22, 0.0  ;;  %v465_v14 = vpop.permute.xlu1 %464 }
 0x206   : > { %v492_v6 = vmul.f32 %v2465_v31, %v465_v14 }
 0x207   : > { %1663 = vmatprep.mubr.f32.mxu0 %v721_v61 }
 0x208   : > { %1664 = vmatmul.mubr.f32.gmra.mrb[10].mxu0 %v722_v58  ;;  %v508_v13 = vadd.f32 %v492_v6, %v408_v17 }
 0x20a   : > { %v364_v63 = vpop.permute.xlu1 %363 }
 0x20b   : > { %v389_v24 = vmul.f32 %v2462_v9, %v364_v63 }
 0x20d   : > { %v409_v33 = vadd.f32 %v2470_v38, %v389_v24 }
 0x20f   : > { %v561_v5 = vpop.permute.xlu1 %560 }
 0x210   : > { %v591_v60 = vmul.f32 %v2474_v42, %v561_v5 }
 0x212   : > { %v607_v29 = vadd.f32 %v591_v60, %v507_v28 }
 0x213   : > { %v565_v40 = vpop.permute.xlu1 %564 }
 0x214   : > { %v707_v3 = vadd.f32 %v691_v1, %v607_v29  ;;  %v592_v34 = vmul.f32 %v2474_v42, %v565_v40 }
 0x216   : > { %v723_v12 = vmax.f32 %v707_v3, 0.0  ;;  %v608_v25 = vadd.f32 %v592_v34, %v508_v13 }
 0x218   : > { %v469_v21 = vpop.permute.xlu1 %468  ;;  %1666 = vmatprep.mubr.f32.mxu0 %v723_v12 }
 0x219   : > { %v493_v27 = vmul.f32 %v2465_v31, %v469_v21 }
 0x21b   : > { %v509_v45 = vadd.f32 %v493_v27, %v409_v33 }
 0x21c   : > { %v473_v16 = vpop.permute.xlu1 %472 }
 0x21d   : > { %v494_v11 = vmul.f32 %v2465_v31, %v473_v16  ;;  %v609_v31 = vadd.f32 %v593_v47, %v509_v45  ;;  %v1544_v45 = vld [vmem:[#allocation2 + $0x118] ss:$0 sm:$0xff] }
 0x21f   : > { %v510_v39 = vadd.f32 %v494_v11, %v410_v32 }
 0x221   : > { %v665_v10 = vpop.permute.xlu1 %664 }
 0x222   : > { %v692_v26 = vmul.f32 %v2477_v44, %v665_v10 }
 0x224   : > { %v708_v30 = vadd.f32 %v692_v26, %v608_v25 }
 0x226   : > { %v724_v36 = vmax.f32 %v708_v30, 0.0  ;;  %v573_v37 = vpop.permute.xlu1 %572 }
 0x227   : > { %v594_v8 = vmul.f32 %v2474_v42, %v573_v37 }
 0x228   : > { %1667 = vmatmul.mubr.f32.gmra.mrb[12].mxu0 %v724_v36 }
 0x229   : > { %v610_v9 = vadd.f32 %v594_v8, %v510_v39 }
 0x22b   : > { %v669_v49 = vpop.permute.xlu1 %668  ;;  %v710_v18 = vadd.f32 %v694_v48, %v610_v9 }
 0x22c   : > { %v693_v52 = vmul.f32 %v2477_v44, %v669_v49 }
 0x22d   : > { %v726_v15 = vmax.f32 %v710_v18, 0.0 }
 0x22e   : > { %v709_v53 = vadd.f32 %v693_v52, %v609_v31 }
 0x230   : > { %v725_v38 = vmax.f32 %v709_v53, 0.0 }
 0x232   : > { %1669 = vmatprep.mubr.f32.mxu0 %v725_v38 }
 0x233   : > { %1670 = vmatmul.mubr.f32.gmra.mrb[14].mxu0 %v726_v15 }
 0x263   : > { %v1650_v54 = vpop.f32.mrb[0].mxu0 }
 0x264   : > { %v820_v55 = vadd.f32 %v1650_v54, %v1543_v7  ;;  %v814_v56 = vpop.f32.mrb[1].mxu0 }
 0x265   : > { %v815_v51 = vadd.f32 %v1543_v7, %v814_v56 }
 0x266   : > { %v894_v59 = vmax.f32 %v820_v55, 0.0 }
 0x267   : > { %v893_v57 = vmax.f32 %v815_v51, 0.0 }
 0x269   : > { %1704 = vmatprep.mubr.f32.mxu1 %v893_v57 }
 0x26a   : > { %1705 = vmatmul.mubr.f32.vlgmr.msra.gmra.mrb[0].mxu1 %v894_v59 }
 0x27b   : > { %v1653_v42 = vpop.f32.mrb[2].mxu0 }
 0x27c   : > { %v830_v4 = vadd.f32 %v1653_v42, %v1543_v7  ;;  %v824_v35 = vpop.f32.mrb[3].mxu0 }
 0x27d   : > { %v825_v22 = vadd.f32 %v1543_v7, %v824_v35 }
 0x27e   : > { %v896_v61 = vmax.f32 %v830_v4, 0.0 }
 0x27f   : > { %v895_v44 = vmax.f32 %v825_v22, 0.0 }
 0x281   : > { %1707 = vmatprep.mubr.f32.mxu1 %v895_v44 }
 0x282   : > { %1708 = vmatmul.mubr.f32.gmra.mrb[2].mxu1 %v896_v61 }
 0x28f   : > { %v1656_v14 = vpop.f32.mrb[4].mxu0 }
 0x290   : > { %v840_v58 = vadd.f32 %v1656_v14, %v1543_v7  ;;  %v834_v62 = vpop.f32.mrb[5].mxu0 }
 0x291   : > { %v835_v63 = vadd.f32 %v1543_v7, %v834_v62 }
 0x292   : > { %v898_v50 = vmax.f32 %v840_v58, 0.0 }
 0x293   : > { %v897_v0 = vmax.f32 %v835_v63, 0.0 }
 0x295   : > { %1710 = vmatprep.mubr.f32.mxu1 %v897_v0 }
 0x296   : > { %1711 = vmatmul.mubr.f32.gmra.mrb[4].mxu1 %v898_v50 }
 0x2af   : > { %v1659_v5 = vpop.f32.mrb[6].mxu0 }
 0x2b0   : > { %v850_v28 = vadd.f32 %v1659_v5, %v1543_v7  ;;  %v844_v60 = vpop.f32.mrb[7].mxu0 }
 0x2b1   : > { %v845_v1 = vadd.f32 %v1543_v7, %v844_v60 }
 0x2b2   : > { %v900_v40 = vmax.f32 %v850_v28, 0.0 }
 0x2b3   : > { %v899_v29 = vmax.f32 %v845_v1, 0.0 }
 0x2b5   : > { %1713 = vmatprep.mubr.f32.mxu1 %v899_v29 }
 0x2b6   : > { %1714 = vmatmul.mubr.f32.gmra.mrb[6].mxu1 %v900_v40 }
 0x2c7   : > { %v1662_v3 = vpop.f32.mrb[8].mxu0 }
 0x2c8   : > { %v860_v12 = vadd.f32 %v1662_v3, %v1543_v7  ;;  %v854_v21 = vpop.f32.mrb[9].mxu0 }
 0x2c9   : > { %v855_v46 = vadd.f32 %v1543_v7, %v854_v21 }
 0x2ca   : > { %v902_v16 = vmax.f32 %v860_v12, 0.0 }
 0x2cb   : > { %v901_v6 = vmax.f32 %v855_v46, 0.0 }
 0x2cd   : > { %1716 = vmatprep.mubr.f32.mxu1 %v901_v6 }
 0x2ce   : > { %1717 = vmatmul.mubr.f32.gmra.mrb[8].mxu1 %v902_v16 }
 0x2db   : > { %v1665_v17 = vpop.f32.mrb[10].mxu0 }
 0x2dc   : > { %v870_v34 = vadd.f32 %v1665_v17, %v1543_v7  ;;  %v864_v13 = vpop.f32.mrb[11].mxu0 }
 0x2dd   : > { %v865_v41 = vadd.f32 %v1543_v7, %v864_v13 }
 0x2de   : > { %v904_v20 = vmax.f32 %v870_v34, 0.0 }
 0x2df   : > { %v903_v10 = vmax.f32 %v865_v41, 0.0 }
 0x2e1   : > { %1719 = vmatprep.mubr.f32.mxu1 %v903_v10 }
 0x2e2   : > { %1720 = vmatmul.mubr.f32.gmra.mrb[10].mxu1 %v904_v20  ;;  %v2676_v20 = vld [vmem:[#allocation2 + $0x120] ss:$0 sm:$0xff] }
 0x2fb   : > { %v1668_v24 = vpop.f32.mrb[12].mxu0 }
 0x2fc   : > { %v880_v25 = vadd.f32 %v1668_v24, %v1543_v7  ;;  %v874_v26 = vpop.f32.mrb[13].mxu0 }
 0x2fd   : > { %v875_v11 = vadd.f32 %v1543_v7, %v874_v26 }
 0x2fe   : > { %v906_v30 = vmax.f32 %v880_v25, 0.0  ;;  %v1303_v25 = vld [vmem:[#allocation2 + $0x121] sm:$0x1] }
 0x2ff   : > { %v905_v27 = vmax.f32 %v875_v11, 0.0 }
 0x301   : > { %1722 = vmatprep.mubr.f32.mxu1 %v905_v27  ;;  %v1305_v27 = vsel %vm1304_vm2, %v1303_v25, 0.0 }
 0x302   : > { %1723 = vmatmul.mubr.f32.gmra.mrb[12].mxu1 %v906_v30 }
 0x306   : > { %v1671_v32 = vpop.f32.mrb[14].mxu0 }
 0x307   : > { %v890_v33 = vadd.f32 %v1671_v32, %v1543_v7  ;;  %v884_v36 = vpop.f32.mrb[15].mxu0 }
 0x308   : > { %v885_v37 = vadd.f32 %v1543_v7, %v884_v36 }
 0x309   : > { %v908_v8 = vmax.f32 %v890_v33, 0.0 }
 0x30a   : > { %v907_v39 = vmax.f32 %v885_v37, 0.0 }
 0x30c   : > { %1725 = vmatprep.mubr.f32.mxu1 %v907_v39 }
 0x30d   : > { %1726 = vmatmul.mubr.f32.gmra.mrb[14].mxu1 %v908_v8 }
 0x33d   : > { %v1706_v9 = vpop.f32.mrb[0].mxu1 }
 0x33e   : > { %v2601_v47 = vadd.f32 %v1706_v9, %v1544_v45  ;;  %v996_v48 = vpop.f32.mrb[1].mxu1 }
 0x33f   : > { %v2603_v49 = vadd.f32 %v1544_v45, %v996_v48 }
 0x340   : > { %v1079_v31 = vsel %vm1077_vm1, %v2601_v47, -1e+30  ;;  %v1287_v33 = vmax.f32 %v2601_v47, 0.0 }
 0x341   : > { %1096 = vmax.xlane.f32.xlu0 %v1079_v31  ;;  %v1078_v52 = vsel %vm1077_vm1, %v2603_v49, -1e+30  ;;  %v1286_v10 = vmax.f32 %v2603_v49, 0.0 }
 0x342   : > { %1094 = vmax.xlane.f32.xlu1 %v1078_v52 }
 0x343   : > { %v1312_v11 = vmul.f32 %v2676_v20, %v1286_v10 }
 0x355   : > { %v1709_v23 = vpop.f32.mrb[2].mxu1 }
 0x356   : > { %v2611_v18 = vadd.f32 %v1709_v23, %v1544_v45  ;;  %v1006_v53 = vpop.f32.mrb[3].mxu1 }
 0x357   : > { %v2613_v38 = vadd.f32 %v1544_v45, %v1006_v53 }
 0x358   : > { %v1081_v15 = vsel %vm1077_vm1, %v2611_v18, -1e+30  ;;  %v1289_v9 = vmax.f32 %v2611_v18, 0.0 }
 0x359   : > { %1100 = vmax.xlane.f32.xlu0 %v1081_v15  ;;  %v1080_v7 = vsel %vm1077_vm1, %v2613_v38, -1e+30  ;;  %v1288_v30 = vmax.f32 %v2613_v38, 0.0 }
 0x35a   : > { %1098 = vmax.xlane.f32.xlu1 %v1080_v7  ;;  %v1315_v7 = vmul.f32 %v2676_v20, %v1289_v9 }
 0x35b   : > { %v1314_v37 = vmul.f32 %v2676_v20, %v1288_v30 }
 0x369   : > { %v1712_v54 = vpop.f32.mrb[4].mxu1 }
 0x36a   : > { %v2621_v55 = vadd.f32 %v1712_v54, %v1544_v45  ;;  %v1016_v56 = vpop.f32.mrb[5].mxu1 }
 0x36b   : > { %v2623_v51 = vadd.f32 %v1544_v45, %v1016_v56 }
 0x36c   : > { %v1083_v57 = vsel %vm1077_vm1, %v2621_v55, -1e+30  ;;  %v1291_v54 = vmax.f32 %v2621_v55, 0.0 }
 0x36d   : > { %1104 = vmax.xlane.f32.xlu0 %v1083_v57  ;;  %v1082_v59 = vsel %vm1077_vm1, %v2623_v51, -1e+30  ;;  %v1290_v39 = vmax.f32 %v2623_v51, 0.0 }
 0x36e   : > { %1102 = vmax.xlane.f32.xlu1 %v1082_v59 }
 0x36f   : > { %v1316_v23 = vmul.f32 %v2676_v20, %v1290_v39 }
 0x389   : > { %v1715_v42 = vpop.f32.mrb[6].mxu1 }
 0x38a   : > { %v2631_v4 = vadd.f32 %v1715_v42, %v1544_v45  ;;  %v1026_v35 = vpop.f32.mrb[7].mxu1 }
 0x38b   : > { %v2633_v22 = vadd.f32 %v1544_v45, %v1026_v35 }
 0x38c   : > { %v1085_v44 = vsel %vm1077_vm1, %v2631_v4, -1e+30 }
 0x38d   : > { %1108 = vmax.xlane.f32.xlu0 %v1085_v44  ;;  %v1084_v61 = vsel %vm1077_vm1, %v2633_v22, -1e+30  ;;  %v1292_v53 = vmax.f32 %v2633_v22, 0.0 }
 0x38e   : > { %1106 = vmax.xlane.f32.xlu1 %v1084_v61 }
 0x38f   : > { %v1318_v42 = vmul.f32 %v2676_v20, %v1292_v53 }
 0x3a1   : > { %v1718_v14 = vpop.f32.mrb[8].mxu1 }
 0x3a2   : > { %v2641_v58 = vadd.f32 %v1718_v14, %v1544_v45  ;;  %v1036_v62 = vpop.f32.mrb[9].mxu1  ;;  %v1317_v14 = vmul.f32 %v2676_v20, %v1291_v54 }
 0x3a3   : > { %v2643_v63 = vadd.f32 %v1544_v45, %v1036_v62  ;;  %v1293_v62 = vmax.f32 %v2631_v4, 0.0 }
 0x3a4   : > { %v1087_v0 = vsel %vm1077_vm1, %v2641_v58, -1e+30 }
 0x3a5   : > { %1112 = vmax.xlane.f32.xlu0 %v1087_v0  ;;  %v1086_v50 = vsel %vm1077_vm1, %v2643_v63, -1e+30  ;;  %v1294_v35 = vmax.f32 %v2643_v63, 0.0 }
 0x3a6   : > { %1110 = vmax.xlane.f32.xlu1 %v1086_v50 }
 0x3b5   : > { %v1721_v5 = vpop.f32.mrb[10].mxu1 }
 0x3b6   : > { %v2651_v28 = vadd.f32 %v1721_v5, %v1544_v45  ;;  %v1046_v60 = vpop.f32.mrb[11].mxu1  ;;  %v1320_v5 = vmul.f32 %v2676_v20, %v1294_v35 }
 0x3b7   : > { %v2653_v1 = vadd.f32 %v1544_v45, %v1046_v60 }
 0x3b8   : > { %v1089_v29 = vsel %vm1077_vm1, %v2651_v28, -1e+30 }
 0x3b9   : > { %1116 = vmax.xlane.f32.xlu0 %v1089_v29  ;;  %v1088_v40 = vsel %vm1077_vm1, %v2653_v1, -1e+30  ;;  %v1296_v60 = vmax.f32 %v2653_v1, 0.0 }
 0x3ba   : > { %1114 = vmax.xlane.f32.xlu1 %v1088_v40  ;;  %v1319_v40 = vmul.f32 %v2676_v20, %v1293_v62 }
 0x3ce   : > { %v2686_v32 = vpop.xlane.xlu0 %1096 }
 0x3cf   : > { %v1127_v36 = vsub.f32 %v2601_v47, %v2686_v32  ;;  %v2697_v48 = vpop.xlane.xlu1 %1094 }
 0x3d0   : > { %v1126_v15 = vsub.f32 %v2603_v49, %v2697_v48 }
 0x3d1   : > { %v1143_v31 = vsel %vm1077_vm1, %v1127_v36, -1e+30 }
 0x3d2   : > { %v1160_v57 = vmul.f32 1.442695, %v1143_v31  ;;  %v1142_v44 = vsel %vm1077_vm1, %v1126_v15, -1e+30 }
 0x3d3   : > { %v1158_v50 = vmul.f32 1.442695, %v1142_v44 }
 0x3d4   : > { %1930 = vpow2.f32 %v1160_v57 }
 0x3d5   : > { %v1724_v3 = vpop.f32.mrb[12].mxu1 }
 0x3d6   : > { %v2661_v12 = vadd.f32 %v1724_v3, %v1544_v45  ;;  %v1056_v21 = vpop.f32.mrb[13].mxu1  ;;  %v1295_v3 = vmax.f32 %v2641_v58, 0.0 }
 0x3d7   : > { %v2663_v46 = vadd.f32 %v1544_v45, %v1056_v21 }
 0x3d8   : > { %v1091_v6 = vsel %vm1077_vm1, %v2661_v12, -1e+30  ;;  %v1321_v10 = vmul.f32 %v2676_v20, %v1295_v3 }
 0x3d9   : > { %1120 = vmax.xlane.f32.xlu0 %v1091_v6  ;;  %v1090_v16 = vsel %vm1077_vm1, %v2663_v46, -1e+30 }
 0x3da   : > { %1118 = vmax.xlane.f32.xlu1 %v1090_v16  ;;  %v1322_v16 = vmul.f32 %v2676_v20, %v1296_v60 }
 0x3de   : > { %v1931_v30 = vpop.eup %1930 }
 0x3e0   : > { %v1727_v17 = vpop.f32.mrb[14].mxu1 }
 0x3e1   : > { %v2671_v34 = vadd.f32 %v1727_v17, %v1544_v45  ;;  %v1066_v13 = vpop.f32.mrb[15].mxu1 }
 0x3e2   : > { %v2673_v41 = vadd.f32 %v1544_v45, %v1066_v13  ;;  %v1313_v45 = vmul.f32 %v2676_v20, %v1287_v33 }
 0x3e3   : > { %v1093_v24 = vsel %vm1077_vm1, %v2671_v34, -1e+30 }
 0x3e4   : > { %1124 = vmax.xlane.f32.xlu0 %v1093_v24  ;;  %v1092_v26 = vsel %vm1077_vm1, %v2673_v41, -1e+30  ;;  %v1297_v24 = vmax.f32 %v2651_v28, 0.0 }
 0x3e5   : > { %1122 = vmax.xlane.f32.xlu1 %v1092_v26 }
 0x3e6   : > { %v2693_v8 = vpop.xlane.xlu0 %1100  ;;  %v1323_v36 = vmul.f32 %v2676_v20, %v1297_v24 }
 0x3e7   : > { %v1129_v52 = vsub.f32 %v2611_v18, %v2693_v8  ;;  %v2709_v56 = vpop.xlane.xlu1 %1098 }
 0x3e8   : > { %1328 = vadd.xlane.f32.xlu0 %v1312_v11  ;;  %v1128_v61 = vsub.f32 %v2613_v38, %v2709_v56 }
 0x3e9   : > { %1306 = vadd.xlane.f32.xlu1 %v1305_v27  ;;  %v1145_v59 = vsel %vm1077_vm1, %v1129_v52, -1e+30 }
 0x3ea   : > { %v1164_v0 = vmul.f32 1.442695, %v1145_v59  ;;  %v1144_v29 = vsel %vm1077_vm1, %v1128_v61, -1e+30 }
 0x3eb   : > { %v1162_v21 = vmul.f32 1.442695, %v1144_v29 }
 0x3ec   : > { %1332 = vadd.xlane.f32.xlu0 %v1314_v37  ;;  %1932 = vpow2.f32 %v1164_v0 }
 0x3ed   : > { %1330 = vadd.xlane.f32.xlu1 %v1313_v45  ;;  %1934 = vpow2.f32 %v1158_v50 }
 0x3ee   : > { %1936 = vpow2.f32 %v1162_v21 }
 0x3f0   : > { %1336 = vadd.xlane.f32.xlu0 %v1316_v23 }
 0x3f1   : > { %1334 = vadd.xlane.f32.xlu1 %v1315_v7 }
 0x3f4   : > { %1340 = vadd.xlane.f32.xlu0 %v1318_v42 }
 0x3f5   : > { %1338 = vadd.xlane.f32.xlu1 %v1317_v14 }
 0x3f6   : > { %v1933_v37 = vpop.eup %1932 }
 0x3f7   : > { %v1935_v39 = vpop.eup %1934 }
 0x3f8   : > { %1344 = vadd.xlane.f32.xlu0 %v1320_v5  ;;  %v1937_v45 = vpop.eup %1936 }
 0x3f9   : > { %1342 = vadd.xlane.f32.xlu1 %v1319_v40 }
 0x3fa   : > { %v2727_v6 = vpop.xlane.xlu0 %1104 }
 0x3fb   : > { %v1131_v17 = vsub.f32 %v2621_v55, %v2727_v6  ;;  %v2732_v13 = vpop.xlane.xlu1 %1102 }
 0x3fc   : > { %v1130_v25 = vsub.f32 %v2623_v51, %v2732_v13  ;;  %1348 = vadd.xlane.f32.xlu0 %v1322_v16 }
 0x3fd   : > { %v1147_v26 = vsel %vm1077_vm1, %v1131_v17, -1e+30  ;;  %1346 = vadd.xlane.f32.xlu1 %v1321_v10 }
 0x3fe   : > { %v1168_v11 = vmul.f32 1.442695, %v1147_v26  ;;  %v1146_v27 = vsel %vm1077_vm1, %v1130_v25, -1e+30 }
 0x3ff   : > { %v1166_v33 = vmul.f32 1.442695, %v1146_v27 }
 0x400   : > { %1938 = vpow2.f32 %v1168_v11  ;;  %1192 = vadd.xlane.f32.xlu0 %v1931_v30 }
 0x401   : > { %1940 = vpow2.f32 %v1166_v33  ;;  %1350 = vadd.xlane.f32.xlu1 %v1323_v36 }
 0x404   : > { %1196 = vadd.xlane.f32.xlu0 %v1933_v37 }
 0x405   : > { %1190 = vadd.xlane.f32.xlu1 %v1935_v39 }
 0x409   : > { %1194 = vadd.xlane.f32.xlu1 %v1937_v45 }
 0x40a   : > { %v1939_v9 = vpop.eup %1938 }
 0x40b   : > { %v1941_v31 = vpop.eup %1940  ;;  %1200 = vadd.xlane.f32.xlu0 %v1939_v9 }
 0x40d   : > { %1198 = vadd.xlane.f32.xlu1 %v1941_v31 }
 0x41a   : > { %v2743_v52 = vpop.xlane.xlu0 %1108 }
 0x41b   : > { %v1133_v23 = vsub.f32 %v2631_v4, %v2743_v52  ;;  %v2747_v53 = vpop.xlane.xlu1 %1106 }
 0x41c   : > { %v1132_v15 = vsub.f32 %v2633_v22, %v2747_v53 }
 0x41d   : > { %v1149_v7 = vsel %vm1077_vm1, %v1133_v23, -1e+30 }
 0x41e   : > { %v1172_v54 = vmul.f32 1.442695, %v1149_v7  ;;  %v1148_v57 = vsel %vm1077_vm1, %v1132_v15, -1e+30 }
 0x41f   : > { %v1170_v59 = vmul.f32 1.442695, %v1148_v57 }
 0x420   : > { %1942 = vpow2.f32 %v1172_v54 }
 0x421   : > { %1944 = vpow2.f32 %v1170_v59 }
 0x42a   : > { %v1943_v42 = vpop.eup %1942 }
 0x42b   : > { %v1945_v35 = vpop.eup %1944  ;;  %1204 = vadd.xlane.f32.xlu0 %v1943_v42 }
 0x42c   : > { %1202 = vadd.xlane.f32.xlu1 %v1945_v35 }
 0x432   : > { %v2755_v44 = vpop.xlane.xlu0 %1112 }
 0x433   : > { %v1135_v61 = vsub.f32 %v2641_v58, %v2755_v44  ;;  %v2759_v14 = vpop.xlane.xlu1 %1110 }
 0x434   : > { %v1134_v62 = vsub.f32 %v2643_v63, %v2759_v14 }
 0x435   : > { %v1151_v0 = vsel %vm1077_vm1, %v1135_v61, -1e+30 }
 0x436   : > { %v1176_v50 = vmul.f32 1.442695, %v1151_v0  ;;  %v1150_v5 = vsel %vm1077_vm1, %v1134_v62, -1e+30 }
 0x437   : > { %v1174_v60 = vmul.f32 1.442695, %v1150_v5 }
 0x438   : > { %1946 = vpow2.f32 %v1176_v50 }
 0x439   : > { %1948 = vpow2.f32 %v1174_v60 }
 0x442   : > { %v1947_v29 = vpop.eup %1946 }
 0x443   : > { %v1949_v40 = vpop.eup %1948  ;;  %1208 = vadd.xlane.f32.xlu0 %v1947_v29 }
 0x444   : > { %1206 = vadd.xlane.f32.xlu1 %v1949_v40 }
 0x446   : > { %v2767_v3 = vpop.xlane.xlu0 %1116 }
 0x447   : > { %v1137_v21 = vsub.f32 %v2651_v28, %v2767_v3  ;;  %v2771_v16 = vpop.xlane.xlu1 %1114 }
 0x448   : > { %v1136_v17 = vsub.f32 %v2653_v1, %v2771_v16 }
 0x449   : > { %v1153_v10 = vsel %vm1077_vm1, %v1137_v21, -1e+30  ;;  %v1298_v21 = vmax.f32 %v2663_v46, 0.0 }
 0x44a   : > { %v1180_v24 = vmul.f32 1.442695, %v1153_v10  ;;  %v1152_v25 = vsel %vm1077_vm1, %v1136_v17, -1e+30 }
 0x44b   : > { %v1178_v26 = vmul.f32 1.442695, %v1152_v25 }
 0x44c   : > { %1950 = vpow2.f32 %v1180_v24  ;;  %v1299_v24 = vmax.f32 %v2661_v12, 0.0 }
 0x44d   : > { %1952 = vpow2.f32 %v1178_v26 }
 0x456   : > { %v1951_v11 = vpop.eup %1950 }
 0x457   : > { %v1953_v27 = vpop.eup %1952  ;;  %1212 = vadd.xlane.f32.xlu0 %v1951_v11  ;;  %v1324_v11 = vmul.f32 %v2676_v20, %v1298_v21 }
 0x458   : > { %1210 = vadd.xlane.f32.xlu1 %v1953_v27  ;;  %v1300_v27 = vmax.f32 %v2673_v41, 0.0 }
 0x466   : > { %v2779_v30 = vpop.xlane.xlu0 %1120 }
 0x467   : > { %v1139_v33 = vsub.f32 %v2661_v12, %v2779_v30  ;;  %v2783_v36 = vpop.xlane.xlu1 %1118 }
 0x468   : > { %v1138_v37 = vsub.f32 %v2663_v46, %v2783_v36 }
 0x469   : > { %v1155_v39 = vsel %vm1077_vm1, %v1139_v33, -1e+30 }
 0x46a   : > { %v1184_v45 = vmul.f32 1.442695, %v1155_v39  ;;  %v1154_v9 = vsel %vm1077_vm1, %v1138_v37, -1e+30  ;;  %v1325_v37 = vmul.f32 %v2676_v20, %v1299_v24  ;;  %v1301_v39 = vmax.f32 %v2671_v34, 0.0 }
 0x46b   : > { %v1182_v31 = vmul.f32 1.442695, %v1154_v9  ;;  %v1326_v9 = vmul.f32 %v2676_v20, %v1300_v27 }
 0x46c   : > { %1954 = vpow2.f32 %v1184_v45 }
 0x46d   : > { %1956 = vpow2.f32 %v1182_v31 }
 0x471   : > { %v2791_v23 = vpop.xlane.xlu0 %1124 }
 0x472   : > { %v1141_v15 = vsub.f32 %v2671_v34, %v2791_v23  ;;  %v2795_v7 = vpop.xlane.xlu1 %1122 }
 0x473   : > { %v1140_v54 = vsub.f32 %v2673_v41, %v2795_v7 }
 0x474   : > { %v1157_v57 = vsel %vm1077_vm1, %v1141_v15, -1e+30  ;;  %v1327_v15 = vmul.f32 %v2676_v20, %v1301_v39 }
 0x475   : > { %v1188_v59 = vmul.f32 1.442695, %v1157_v57  ;;  %v1156_v42 = vsel %vm1077_vm1, %v1140_v54, -1e+30  ;;  %v1329_v35 = vpop.xlane.xlu0 %1328 }
 0x476   : > { %v1955_v61 = vpop.eup %1954  ;;  %v1186_v62 = vmul.f32 1.442695, %v1156_v42  ;;  %v1307_v0 = vpop.xlane.xlu1 %1306 }
 0x477   : > { %v1957_v50 = vpop.eup %1956  ;;  %1958 = vpow2.f32 %v1188_v59  ;;  %1216 = vadd.xlane.f32.xlu0 %v1955_v61  ;;  %v2825_v42 = vrot.slane %v1307_v0, %v373_v2 }
 0x478   : > { %1960 = vpow2.f32 %v1186_v62  ;;  %1214 = vadd.xlane.f32.xlu1 %v1957_v50 }
 0x479   : > { %v1333_v5 = vpop.xlane.xlu0 %1332  ;;  %v1364_v21 = vadd.f32 %v2825_v42, %v1329_v35 }
 0x47a   : > { %v1331_v60 = vpop.xlane.xlu1 %1330  ;;  %v1366_v0 = vadd.f32 %v2825_v42, %v1333_v5 }
 0x47b   : > { %v1365_v61 = vadd.f32 %v2825_v42, %v1331_v60 }
 0x47d   : > { %v1337_v29 = vpop.xlane.xlu0 %1336 }
 0x47e   : > { %v1335_v40 = vpop.xlane.xlu1 %1334  ;;  %v1368_v39 = vadd.f32 %v2825_v42, %v1337_v29 }
 0x47f   : > { %v1367_v20 = vadd.f32 %v2825_v42, %v1335_v40 }
 0x481   : > { %v1959_v17 = vpop.eup %1958  ;;  %v2804_v10 = vpop.xlane.xlu0 %1340 }
 0x482   : > { %v1961_v25 = vpop.eup %1960  ;;  %v1339_v26 = vpop.xlane.xlu1 %1338  ;;  %1220 = vadd.xlane.f32.xlu0 %v1959_v17 }
 0x483   : > { %1218 = vadd.xlane.f32.xlu1 %v1961_v25  ;;  %v1369_v35 = vadd.f32 %v2825_v42, %v1339_v26 }
 0x485   : > { %v2809_v33 = vpop.xlane.xlu0 %1344 }
 0x486   : > { %v2813_v45 = vpop.xlane.xlu1 %1342  ;;  %1352 = vadd.xlane.f32.xlu0 %v1324_v11 }
 0x487   : > { %1354 = vadd.xlane.f32.xlu1 %v1325_v37 }
 0x489   : > { %v2816_v31 = vpop.xlane.xlu0 %1348 }
 0x48a   : > { %v2819_v54 = vpop.xlane.xlu1 %1346  ;;  %1356 = vadd.xlane.f32.xlu0 %v1326_v9 }
 0x48b   : > { %1358 = vadd.xlane.f32.xlu1 %v1327_v15 }
 0x48d   : > { %v1193_v57 = vpop.xlane.xlu0 %1192 }
 0x48e   : > { %1962 = vlog2.f32 %v1193_v57  ;;  %v2821_v59 = vpop.xlane.xlu1 %1350 }
 0x491   : > { %v1197_v62 = vpop.xlane.xlu0 %1196 }
 0x492   : > { %1964 = vlog2.f32 %v1197_v62  ;;  %v1191_v50 = vpop.xlane.xlu1 %1190 }
 0x493   : > { %1966 = vlog2.f32 %v1191_v50 }
 0x494   : > { %1968 = vtanh.f32 %v1365_v61 }
 0x496   : > { %v1195_v17 = vpop.xlane.xlu1 %1194 }
 0x497   : > { %1970 = vlog2.f32 %v1195_v17 }
 0x498   : > { %v1963_v24 = vpop.eup %1962  ;;  %1972 = vtanh.f32 %v1367_v20  ;;  %v1201_v19 = vpop.xlane.xlu0 %1200 }
 0x499   : > { %v1225_v2 = vmul.f32 0.6931472, %v1963_v24  ;;  %1974 = vlog2.f32 %v1201_v19 }
 0x49a   : > { %1976 = vtanh.f32 %v1364_v21  ;;  %v1199_v60 = vpop.xlane.xlu1 %1198 }
 0x49b   : > { %v1255_v25 = vadd.f32 %v1225_v2, %v2686_v32  ;;  %1978 = vlog2.f32 %v1199_v60 }
 0x49c   : > { %v1965_v40 = vpop.eup %1964  ;;  %1980 = vtanh.f32 %v1366_v0 }
 0x49d   : > { %v1967_v11 = vpop.eup %1966  ;;  %v1271_v27 = vsub.f32 %v2601_v47, %v1255_v25  ;;  %v1229_v37 = vmul.f32 0.6931472, %v1965_v40  ;;  %1982 = vtanh.f32 %v1369_v35 }
 0x49e   : > { %v1223_v5 = vmul.f32 0.6931472, %v1967_v11  ;;  %v1969_v9 = vpop.eup %1968  ;;  %1984 = vtanh.f32 %v1368_v39 }
 0x49f   : > { %v1397_v15 = vsel %vm1077_vm1, %v1271_v27, 0.0  ;;  %v1257_v32 = vadd.f32 %v1229_v37, %v2693_v8 }
 0x4a0   : > { %v1414_v26 = vsel %vm1412_vm3, %v1969_v9, %v1397_v15  ;;  %v1254_v57 = vadd.f32 %v1223_v5, %v2697_v48  ;;  %v1371_v15 = vadd.f32 %v2825_v42, %v2813_v45 }
 0x4a1   : > { %v1971_v61 = vpop.eup %1970  ;;  %1430 = vst [vmem:[%s2845_s25 + $0x8] sm:$0xff] %v1414_v26  ;;  %v1273_v47 = vsub.f32 %v2611_v18, %v1257_v32 }
 0x4a2   : > { %v1973_v29 = vpop.eup %1972  ;;  %v1270_v62 = vsub.f32 %v2603_v49, %v1254_v57  ;;  %v1227_v8 = vmul.f32 0.6931472, %v1971_v61 }
 0x4a3   : > { %v1975_v50 = vpop.eup %1974  ;;  %v1399_v20 = vsel %vm1077_vm1, %v1273_v47, 0.0 }
 0x4a4   : > { %v1977_v21 = vpop.eup %1976  ;;  %v1416_v48 = vsel %vm1412_vm3, %v1973_v29, %v1399_v20  ;;  %v1396_v17 = vsel %vm1077_vm1, %v1270_v62, 0.0  ;;  %v1256_v24 = vadd.f32 %v1227_v8, %v2709_v56  ;;  %v1233_v18 = vmul.f32 0.6931472, %v1975_v50 }
 0x4a5   : > { %v1979_v19 = vpop.eup %1978  ;;  %1432 = vst [vmem:[%s2845_s25 + $0x18] sm:$0xff] %v1416_v48  ;;  %v1413_v49 = vsel %vm1412_vm3, %v1977_v21, %v1396_v17  ;;  %v1372_v48 = vadd.f32 %v2825_v42, %v2809_v33 }
 0x4a6   : > { %1429 = vst [vmem:[%s2845_s25] sm:$0xff] %v1413_v49  ;;  %v1272_v2 = vsub.f32 %v2613_v38, %v1256_v24  ;;  %v1259_v0 = vadd.f32 %v1233_v18, %v2727_v6  ;;  %v1231_v60 = vmul.f32 0.6931472, %v1979_v19  ;;  %v1981_v25 = vpop.eup %1980 }
 0x4a7   : > { %v1983_v27 = vpop.eup %1982 }
 0x4a8   : > { %v1398_v40 = vsel %vm1077_vm1, %v1272_v2, 0.0  ;;  %v1275_v56 = vsub.f32 %v2621_v55, %v1259_v0  ;;  %v1258_v35 = vadd.f32 %v1231_v60, %v2732_v13  ;;  %v1985_v39 = vpop.eup %1984 }
 0x4a9   : > { %v1415_v11 = vsel %vm1412_vm3, %v1981_v25, %v1398_v40 }
 0x4aa   : > { %1431 = vst [vmem:[%s2845_s25 + $0x10] sm:$0xff] %v1415_v11  ;;  %v1401_v38 = vsel %vm1077_vm1, %v1275_v56, 0.0  ;;  %v1274_v6 = vsub.f32 %v2623_v51, %v1258_v35  ;;  %v1370_v51 = vadd.f32 %v2825_v42, %v2804_v10  ;;  %v1374_v35 = vadd.f32 %v2825_v42, %v2816_v31 }
 0x4ab   : > { %v1418_v37 = vsel %vm1412_vm3, %v1983_v27, %v1401_v38 }
 0x4ac   : > { %1434 = vst [vmem:[%s2845_s25 + $0x28] sm:$0xff] %v1418_v37  ;;  %v1400_v55 = vsel %vm1077_vm1, %v1274_v6, 0.0 }
 0x4ad   : > { %v1417_v13 = vsel %vm1412_vm3, %v1985_v39, %v1400_v55 }
 0x4ae   : > { %1433 = vst [vmem:[%s2845_s25 + $0x20] sm:$0xff] %v1417_v13 }
 0x4b8   : > { %v1205_v5 = vpop.xlane.xlu0 %1204 }
 0x4b9   : > { %1986 = vlog2.f32 %v1205_v5  ;;  %v1203_v9 = vpop.xlane.xlu1 %1202 }
 0x4ba   : > { %1988 = vlog2.f32 %v1203_v9 }
 0x4bb   : > { %1990 = vtanh.f32 %v1371_v15 }
 0x4bc   : > { %1992 = vtanh.f32 %v1370_v51 }
 0x4c3   : > { %v1987_v32 = vpop.eup %1986 }
 0x4c4   : > { %v1989_v26 = vpop.eup %1988  ;;  %v1237_v57 = vmul.f32 0.6931472, %v1987_v32 }
 0x4c5   : > { %v1235_v61 = vmul.f32 0.6931472, %v1989_v26  ;;  %v1991_v45 = vpop.eup %1990 }
 0x4c6   : > { %v1261_v47 = vadd.f32 %v1237_v57, %v2743_v52  ;;  %v1993_v50 = vpop.eup %1992 }
 0x4c7   : > { %v1260_v29 = vadd.f32 %v1235_v61, %v2747_v53 }
 0x4c8   : > { %v1277_v62 = vsub.f32 %v2631_v4, %v1261_v47 }
 0x4c9   : > { %v1276_v8 = vsub.f32 %v2633_v22, %v1260_v29  ;;  %v1373_v22 = vadd.f32 %v2825_v42, %v2819_v54 }
 0x4ca   : > { %v1403_v10 = vsel %vm1077_vm1, %v1277_v62, 0.0 }
 0x4cb   : > { %v1420_v20 = vsel %vm1412_vm3, %v1991_v45, %v1403_v10  ;;  %v1402_v21 = vsel %vm1077_vm1, %v1276_v8, 0.0 }
 0x4cc   : > { %1436 = vst [vmem:[%s2845_s25 + $0x38] sm:$0xff] %v1420_v20  ;;  %v1419_v52 = vsel %vm1412_vm3, %v1993_v50, %v1402_v21 }
 0x4cd   : > { %1435 = vst [vmem:[%s2845_s25 + $0x30] sm:$0xff] %v1419_v52 }
 0x4d0   : > { %v1209_v53 = vpop.xlane.xlu0 %1208 }
 0x4d1   : > { %1994 = vlog2.f32 %v1209_v53  ;;  %v1207_v4 = vpop.xlane.xlu1 %1206 }
 0x4d2   : > { %1996 = vlog2.f32 %v1207_v4 }
 0x4d3   : > { %1998 = vtanh.f32 %v1373_v22 }
 0x4d4   : > { %2000 = vtanh.f32 %v1372_v48 }
 0x4db   : > { %v1995_v17 = vpop.eup %1994 }
 0x4dc   : > { %v1997_v24 = vpop.eup %1996  ;;  %v1241_v18 = vmul.f32 0.6931472, %v1995_v17 }
 0x4dd   : > { %v1239_v19 = vmul.f32 0.6931472, %v1997_v24  ;;  %v1999_v54 = vpop.eup %1998 }
 0x4de   : > { %v1263_v49 = vadd.f32 %v1241_v18, %v2755_v44  ;;  %v2001_v25 = vpop.eup %2000 }
 0x4df   : > { %v1262_v2 = vadd.f32 %v1239_v19, %v2759_v14 }
 0x4e0   : > { %v1279_v0 = vsub.f32 %v2641_v58, %v1263_v49 }
 0x4e1   : > { %v1278_v60 = vsub.f32 %v2643_v63, %v1262_v2  ;;  %v1375_v63 = vadd.f32 %v2825_v42, %v2821_v59 }
 0x4e2   : > { %v1405_v33 = vsel %vm1077_vm1, %v1279_v0, 0.0 }
 0x4e3   : > { %v1422_v40 = vsel %vm1412_vm3, %v1999_v54, %v1405_v33  ;;  %v1404_v56 = vsel %vm1077_vm1, %v1278_v60, 0.0 }
 0x4e4   : > { %1438 = vst [vmem:[%s2845_s25 + $0x48] sm:$0xff] %v1422_v40  ;;  %v1421_v44 = vsel %vm1412_vm3, %v2001_v25, %v1404_v56  ;;  %v1213_v14 = vpop.xlane.xlu0 %1212 }
 0x4e5   : > { %1437 = vst [vmem:[%s2845_s25 + $0x40] sm:$0xff] %v1421_v44  ;;  %2002 = vlog2.f32 %v1213_v14  ;;  %v1211_v58 = vpop.xlane.xlu1 %1210 }
 0x4e6   : > { %2004 = vlog2.f32 %v1211_v58 }
 0x4e7   : > { %2006 = vtanh.f32 %v1375_v63 }
 0x4e8   : > { %2008 = vtanh.f32 %v1374_v35 }
 0x4ef   : > { %v2003_v11 = vpop.eup %2002 }
 0x4f0   : > { %v2005_v27 = vpop.eup %2004  ;;  %v1245_v38 = vmul.f32 0.6931472, %v2003_v11 }
 0x4f1   : > { %v1243_v6 = vmul.f32 0.6931472, %v2005_v27  ;;  %v2007_v59 = vpop.eup %2006 }
 0x4f2   : > { %v1265_v37 = vadd.f32 %v1245_v38, %v2767_v3  ;;  %v2009_v5 = vpop.eup %2008 }
 0x4f3   : > { %v1264_v39 = vadd.f32 %v1243_v6, %v2771_v16 }
 0x4f4   : > { %v1281_v55 = vsub.f32 %v2651_v28, %v1265_v37 }
 0x4f5   : > { %v1280_v13 = vsub.f32 %v2653_v1, %v1264_v39 }
 0x4f6   : > { %v1407_v31 = vsel %vm1077_vm1, %v1281_v55, 0.0 }
 0x4f7   : > { %v1424_v9 = vsel %vm1412_vm3, %v2007_v59, %v1407_v31  ;;  %v1406_v15 = vsel %vm1077_vm1, %v1280_v13, 0.0 }
 0x4f8   : > { %1440 = vst [vmem:[%s2845_s25 + $0x58] sm:$0xff] %v1424_v9  ;;  %v1423_v3 = vsel %vm1412_vm3, %v2009_v5, %v1406_v15 }
 0x4f9   : > { %1439 = vst [vmem:[%s2845_s25 + $0x50] sm:$0xff] %v1423_v3 }
 0x504   : > { %v1217_v16 = vpop.xlane.xlu0 %1216 }
 0x505   : > { %v1215_v28 = vpop.xlane.xlu1 %1214 }
 0x506   : > { %2010 = vlog2.f32 %v1215_v28 }
 0x507   : > { %2012 = vlog2.f32 %v1217_v16 }
 0x50f   : > { %v1221_v1 = vpop.xlane.xlu0 %1220 }
 0x510   : > { %2014 = vlog2.f32 %v1221_v1  ;;  %v1219_v51 = vpop.xlane.xlu1 %1218  ;;  %v2011_v32 = vpop.eup %2010 }
 0x511   : > { %2016 = vlog2.f32 %v1219_v51  ;;  %v2013_v26 = vpop.eup %2012  ;;  %v1247_v61 = vmul.f32 0.6931472, %v2011_v32 }
 0x512   : > { %v1249_v62 = vmul.f32 0.6931472, %v2013_v26 }
 0x513   : > { %v1353_v57 = vpop.xlane.xlu0 %1352  ;;  %v1266_v10 = vadd.f32 %v1247_v61, %v2783_v36 }
 0x514   : > { %v1376_v47 = vadd.f32 %v2825_v42, %v1353_v57  ;;  %v1355_v29 = vpop.xlane.xlu1 %1354  ;;  %v1267_v21 = vadd.f32 %v1249_v62, %v2779_v30 }
 0x515   : > { %v1377_v8 = vadd.f32 %v2825_v42, %v1355_v29  ;;  %v1282_v48 = vsub.f32 %v2663_v46, %v1266_v10 }
 0x516   : > { %2018 = vtanh.f32 %v1376_v47  ;;  %v1283_v36 = vsub.f32 %v2661_v12, %v1267_v21 }
 0x517   : > { %2020 = vtanh.f32 %v1377_v8  ;;  %v1357_v45 = vpop.xlane.xlu0 %1356 }
 0x518   : > { %v1378_v50 = vadd.f32 %v2825_v42, %v1357_v45  ;;  %v1359_v20 = vpop.xlane.xlu1 %1358  ;;  %v1409_v2 = vsel %vm1077_vm1, %v1283_v36, 0.0 }
 0x519   : > { %v1379_v52 = vadd.f32 %v2825_v42, %v1359_v20  ;;  %v1408_v42 = vsel %vm1077_vm1, %v1282_v48, 0.0 }
 0x51a   : > { %v2015_v53 = vpop.eup %2014  ;;  %2022 = vtanh.f32 %v1378_v50 }
 0x51b   : > { %v2017_v4 = vpop.eup %2016  ;;  %v1253_v22 = vmul.f32 0.6931472, %v2015_v53  ;;  %2024 = vtanh.f32 %v1379_v52 }
 0x51c   : > { %v1251_v17 = vmul.f32 0.6931472, %v2017_v4 }
 0x51d   : > { %v1269_v24 = vadd.f32 %v1253_v22, %v2791_v23 }
 0x51e   : > { %v1268_v30 = vadd.f32 %v1251_v17, %v2795_v7 }
 0x51f   : > { %v1285_v46 = vsub.f32 %v2671_v34, %v1269_v24 }
 0x520   : > { %v2019_v18 = vpop.eup %2018  ;;  %v1284_v19 = vsub.f32 %v2673_v41, %v1268_v30 }
 0x521   : > { %v2021_v49 = vpop.eup %2020  ;;  %v1425_v12 = vsel %vm1412_vm3, %v2019_v18, %v1408_v42  ;;  %v1411_v0 = vsel %vm1077_vm1, %v1285_v46, 0.0 }
 0x522   : > { %1441 = vst [vmem:[%s2845_s25 + $0x60] sm:$0xff] %v1425_v12  ;;  %v1426_v23 = vsel %vm1412_vm3, %v2021_v49, %v1409_v2  ;;  %v1410_v7 = vsel %vm1077_vm1, %v1284_v19, 0.0 }
 0x523   : > { %1442 = vst [vmem:[%s2845_s25 + $0x68] sm:$0xff] %v1426_v23 }
 0x524   : > { %v2023_v41 = vpop.eup %2022 }
 0x525   : > { %v2025_v34 = vpop.eup %2024  ;;  %v1427_v60 = vsel %vm1412_vm3, %v2023_v41, %v1410_v7 }
 0x526   : > { %1443 = vst [vmem:[%s2845_s25 + $0x70] sm:$0xff] %v1427_v60  ;;  %v1428_v54 = vsel %vm1412_vm3, %v2025_v34, %v1411_v0 }
 0x527   : > { %1444 = vst [vmem:[%s2845_s25 + $0x78] sm:$0xff] %v1428_v54 }
 0x528   : > { %2067 = shalt.err (!%p2064_p7)
}
 0x529   : > { %s2068_s7 = scalar_lea.hbm %s2964_s30, 2048  ;;  %s2072_s16 = scalar_lea.hbm %s3021_s2, 4096 }
 0x52a   : > { %p2069_p8 = scmp.ne.s32.totalorder %s2964_s30, %s2068_s7  ;;  %p2073_p1 = scmp.lt.u32.totalorder %s2964_s30, %s3021_s2 }
 0x52b   : > { %p2074_p0 = scmp.lt.u32.totalorder %s2072_s16, %s2068_s7  ;;  %p2076_p6 = scmp.lt.u32.totalorder %s2068_s7, %s2964_s30 }
 0x52c   : > { %p2070_p11 = pnand %p2069_p8, %p3032_p9 }
 0x52d   : > { %p2075_p5 = por %p2074_p0, %p2073_p1 }
 0x52e   : > { %p2071_p13 = pneg %p2070_p11 }
 0x52f   : > { %p2077_p10 = por %p2076_p6, %p2075_p5 }
 0x531   : > { %p2078_p12 = pnand %p2077_p10, %p2071_p13 }
 0x533   : > { %2081 = shalt.err (!%p2078_p12)
}
 0x534   : > { %s2130_s24 = smov 128   ;;  %s2131_s21 = smov 8  }
 0x535   : > { %1796 = dma.vmem_to_hbm [thread:$0]  (%p3032_p9), %s2966_s27, 2048, %s2964_s30, %s2978_s13, %s2130_s24, %s2130_s24, %s2131_s21  }
 0x536 PF: > { %p1808_p2 = scmp.ge.s32.totalorder %s2120_s12, 2  ;;  %s1474_s23 = sand.u32 1, %s2108_s9  }
 0x537   : > { %p3033_p3 = scmp.ne.s32.totalorder %s3026_s20, 0  ;;  %s1475_s25 = scalar_lea.sflag [#allocation4], %s1474_s23 }
 0x539   : > { %p1803_p4 = pnand %p1808_p2, %p3033_p3 }
 0x53b   : > { %2103 = dma.done.wait (!%p1803_p4), %s1475_s25, 2048  }
 0x53c   : > { %2105 = vsyncadd (!%p1803_p4), %s1475_s25, 4294965248  ;;  %p13_p7 = scmp.ge.s32.totalorder %s2172_s15, 4   ;;  %s3034_s9 = smov %s2112_s10 }
 0x53d   : > { %s3035_s10 = smov %s2116_s11  ;;  %s3036_s11 = smov %s2183_s18 }
 0x53e   : > { %s3037_s12 = smov %s2172_s15  ;;  %15 = sbr.rel (!%p13_p7) target bundleno = 4 (0x4), region = 68 }
 0x545   :  { %1480 = vsyncpa [#allocation3], 1 }
 0x546   :  { %1482 = vsyncpa [#allocation3 + $0x1], 1 }
 0x547   :  { %1483 = vsyncpa [#allocation4], 1 }
 0x548   :  { %1485 = vsyncpa [#allocation4 + $0x1], 1 }

</bundles_post_ra>
